<compile_context>
chip_gen: v6e
topology: v6e:2x2x1
jax: 0.10.0
libtpu: 0.0.40
codegen_flags: <defaults>
</compile_context>

<pallas_src>
import jax
import jax.numpy as jnp
from jax import lax
from jax.experimental import pallas as pl
from jax.experimental.pallas import tpu as pltpu


# ----------------------------------------------------------------------------
# Fused kernel: all LSTM layers + final Linear in one invocation.
# Gate order matches PyTorch nn.LSTM: [i, f, g, o].
# i/f/o columns of the weights/bias arrive pre-scaled by 0.5 so that
# sigmoid(z) == 0.5 * tanh(scaled_preact) + 0.5.
# ----------------------------------------------------------------------------
def _make_fused_kernel(T, Bp, H, num_layers):
    n_in = 1 + 3 * num_layers + 2  # x, (w_ih, w_hh, b) per layer, fc_w, fc_b

    def kernel(*refs):
        x_ref = refs[0]
        fcw_ref = refs[1 + 3 * num_layers]          # (H, 128) bf16, padded
        fcb_ref = refs[2 + 3 * num_layers]          # (1, 128) f32, padded
        out_ref = refs[n_in]                        # (T*Bp, 128) f32

        seq = x_ref[...]                            # (T*Bp, Din) f32, time-major

        for l in range(num_layers):
            w_ih = refs[1 + 3 * l][...]             # (Din_l, 4H) bf16 (pre-scaled)
            w_hh = refs[2 + 3 * l][...]             # (H, 4H)     bf16 (pre-scaled)
            b = refs[3 + 3 * l][...]                # (1, 4H)     f32  (pre-scaled)

            # Hoisted input projection: one matmul for all T timesteps.
            gates_x = jnp.dot(seq.astype(jnp.bfloat16), w_ih,
                              preferred_element_type=jnp.float32) + b  # (T*Bp,4H)

            h = jnp.zeros((Bp, H), jnp.float32)
            c = jnp.zeros((Bp, H), jnp.float32)
            hs = []

            # Sequential recurrence, unrolled (T is small & static).
            for t in range(T):
                g_t = (gates_x[t * Bp:(t + 1) * Bp, :]
                       + jnp.dot(h.astype(jnp.bfloat16), w_hh,
                                 preferred_element_type=jnp.float32))  # (Bp,4H)

                # Single full-vreg tanh on the EUP; sigmoid gates reconstructed
                # with cheap VPU ops (weights were pre-scaled by 0.5).
                th = jnp.tanh(g_t)
                i_g = 0.5 * th[:, 0 * H:1 * H] + 0.5
                f_g = 0.5 * th[:, 1 * H:2 * H] + 0.5
                g_g = th[:, 2 * H:3 * H]
                o_g = 0.5 * th[:, 3 * H:4 * H] + 0.5

                c = f_g * c + i_g * g_g
                h = o_g * jnp.tanh(c)
                hs.append(h)                        # stays in vregs

            seq = jnp.concatenate(hs, axis=0)       # (T*Bp, H), time-major
            # inter-layer dropout: identity (eval mode)

        # fc epilogue on all timesteps at once; dropout before fc is identity.
        # Output is lane-dense (128 columns); real O columns sliced in wrapper.
        out_ref[...] = (jnp.dot(seq.astype(jnp.bfloat16), fcw_ref[...],
                                preferred_element_type=jnp.float32)
                        + fcb_ref[...])

    return kernel


# ----------------------------------------------------------------------------
# Model wrapper
# ----------------------------------------------------------------------------
def lstm_dropout_model(x, lstm_params, fc_w, fc_b2d):
    """x: (B, T, input_size).  Returns (B, T, output_size)."""
    B, T, Din = x.shape
    H = lstm_params[0][1].shape[0]
    O = fc_w.shape[1]
    num_layers = len(lstm_params)

    # Pad batch to a full sublane height (8) so vregs/MXU rows are dense.
    Bp = max(8, ((B + 7) // 8) * 8)
    x_p = jnp.zeros((Bp, T, Din), jnp.float32).at[:B].set(x.astype(jnp.float32))
    x2d = jnp.transpose(x_p, (1, 0, 2)).reshape(T * Bp, Din)   # time-major rows

    # Column scale for the single-tanh trick: 0.5 on i/f/o gates, 1.0 on g.
    col_scale = jnp.concatenate([
        jnp.full((H,), 0.5, jnp.float32),
        jnp.full((H,), 0.5, jnp.float32),
        jnp.ones((H,), jnp.float32),
        jnp.full((H,), 0.5, jnp.float32),
    ])

    operands = [x2d]
    in_specs = [pl.BlockSpec((T * Bp, Din), lambda i: (0, 0))]
    for (w_ih, w_hh, b) in lstm_params:
        w_ih_s = (w_ih * col_scale[None, :]).astype(jnp.bfloat16)
        w_hh_s = (w_hh * col_scale[None, :]).astype(jnp.bfloat16)
        b_s = (b * col_scale[None, :]).astype(jnp.float32)
        operands += [w_ih_s, w_hh_s, b_s]
        in_specs += [
            pl.BlockSpec(w_ih_s.shape, lambda i: (0, 0)),
            pl.BlockSpec(w_hh_s.shape, lambda i: (0, 0)),
            pl.BlockSpec(b_s.shape, lambda i: (0, 0)),
        ]

    # Lane-dense fc: pad output dim O -> 128 (unmasked vst / dense writeback).
    Op = 128
    fc_w_p = (jnp.zeros((H, Op), jnp.float32).at[:, :O].set(fc_w)
              .astype(jnp.bfloat16))
    fc_b_p = jnp.zeros((1, Op), jnp.float32).at[:, :O].set(fc_b2d)
    operands += [fc_w_p, fc_b_p]
    in_specs += [
        pl.BlockSpec(fc_w_p.shape, lambda i: (0, 0)),
        pl.BlockSpec(fc_b_p.shape, lambda i: (0, 0)),
    ]

    kernel = _make_fused_kernel(T, Bp, H, num_layers)

    out2d = pl.pallas_call(
        kernel,
        out_shape=jax.ShapeDtypeStruct((T * Bp, Op), jnp.float32),
        grid_spec=pltpu.PrefetchScalarGridSpec(
            num_scalar_prefetch=0,
            grid=(1,),
            in_specs=in_specs,
            out_specs=pl.BlockSpec((T * Bp, Op), lambda i: (0, 0)),
        ),
        compiler_params=pltpu.CompilerParams(
            dimension_semantics=("arbitrary",)),
    )(*operands)

    out = out2d.reshape(T, Bp, Op)[:, :B, :O]    # drop batch + lane padding
    return jnp.transpose(out, (1, 0, 2))         # (B, T, O)


# ----------------------------------------------------------------------------
# Pure-JAX f32 reference (for a silent sanity check)
# ----------------------------------------------------------------------------
def lstm_dropout_ref(x, lstm_params, fc_w, fc_b2d):
    h_seq = jnp.transpose(x, (1, 0, 2)).astype(jnp.float32)  # (T, B, D)
    for (w_ih, w_hh, b) in lstm_params:
        H = w_hh.shape[0]
        B = h_seq.shape[1]

        def step(carry, xt):
            h, c = carry
            gates = xt @ w_ih + h @ w_hh + b[0]
            i = jax.nn.sigmoid(gates[:, 0 * H:1 * H])
            f = jax.nn.sigmoid(gates[:, 1 * H:2 * H])
            g = jnp.tanh(gates[:, 2 * H:3 * H])
            o = jax.nn.sigmoid(gates[:, 3 * H:4 * H])
            c_new = f * c + i * g
            h_new = o * jnp.tanh(c_new)
            return (h_new, c_new), h_new

        init = (jnp.zeros((B, H), jnp.float32), jnp.zeros((B, H), jnp.float32))
        _, h_seq = lax.scan(step, init, h_seq)
    out = h_seq @ fc_w + fc_b2d[0]
    return jnp.transpose(out, (1, 0, 2))


# ----------------------------------------------------------------------------
# Main
# ----------------------------------------------------------------------------
if __name__ == "__main__":
    input_size = 16
    hidden_size = 32
    num_layers = 2
    output_size = 8
    B, T = 2, 8

    key = jax.random.PRNGKey(0)
    key, xk = jax.random.split(key)
    x = jax.random.normal(xk, (B, T, input_size), dtype=jnp.float32)

    scale = 1.0 / jnp.sqrt(hidden_size)
    lstm_params = []
    for layer in range(num_layers):
        d_in = input_size if layer == 0 else hidden_size
        key, k1, k2, k3, k4 = jax.random.split(key, 5)
        # PyTorch shapes: weight_ih (4H, d_in), weight_hh (4H, H), biases (4H,)
        w_ih_t = jax.random.uniform(k1, (4 * hidden_size, d_in),
                                    minval=-scale, maxval=scale)
        w_hh_t = jax.random.uniform(k2, (4 * hidden_size, hidden_size),
                                    minval=-scale, maxval=scale)
        b_ih = jax.random.uniform(k3, (4 * hidden_size,),
                                  minval=-scale, maxval=scale)
        b_hh = jax.random.uniform(k4, (4 * hidden_size,),
                                  minval=-scale, maxval=scale)
        lstm_params.append((
            jnp.asarray(w_ih_t.T, jnp.float32),               # (d_in, 4H)
            jnp.asarray(w_hh_t.T, jnp.float32),               # (H, 4H)
            jnp.asarray((b_ih + b_hh)[None, :], jnp.float32)  # (1, 4H)
        ))

    key, kfw, kfb = jax.random.split(key, 3)
    fscale = 1.0 / jnp.sqrt(hidden_size)
    fc_w_t = jax.random.uniform(kfw, (output_size, hidden_size),
                                minval=-fscale, maxval=fscale)
    fc_b = jax.random.uniform(kfb, (output_size,),
                              minval=-fscale, maxval=fscale)
    fc_w = jnp.asarray(fc_w_t.T, jnp.float32)                 # (H, O)
    fc_b2d = jnp.asarray(fc_b[None, :], jnp.float32)          # (1, O)

    out = lstm_dropout_model(x, lstm_params, fc_w, fc_b2d)
    out = jax.block_until_ready(out)

    ref = lstm_dropout_ref(x, lstm_params, fc_w, fc_b2d)
    assert out.shape == (B, T, output_size)
    assert jnp.all(jnp.isfinite(out))
    # bf16 matmul operands over the 16 recurrent steps: relaxed tolerance.
    assert jnp.max(jnp.abs(out - ref)) < 2e-2, "mismatch vs reference"

    print("KERNEL_OK")
</pallas_src>

<mosaic_0001>
module attributes {stable_mosaic.version = 11 : i64} {
  func.func @kernel(%arg0: i32, %arg1: memref<64x16xf32, #tpu.memory_space<vmem>>, %arg2: memref<16x128xbf16, #tpu.memory_space<vmem>>, %arg3: memref<32x128xbf16, #tpu.memory_space<vmem>>, %arg4: memref<1x128xf32, #tpu.memory_space<vmem>>, %arg5: memref<32x128xbf16, #tpu.memory_space<vmem>>, %arg6: memref<32x128xbf16, #tpu.memory_space<vmem>>, %arg7: memref<1x128xf32, #tpu.memory_space<vmem>>, %arg8: memref<32x128xbf16, #tpu.memory_space<vmem>>, %arg9: memref<1x128xf32, #tpu.memory_space<vmem>>, %arg10: memref<64x128xf32, #tpu.memory_space<vmem>>) attributes {dimension_semantics = [#tpu.dimension_semantics<arbitrary>], iteration_bounds = array<i64: 1>, scalar_prefetch = 0 : i64, scratch_operands = 0 : i64, tpu.core_type = #tpu.core_type<tc>, window_params = [{pipeline_mode = #tpu.pipeline_mode<synchronous>, transform_indices = @transform_0, window_bounds = array<i64: 64, 16>}, {pipeline_mode = #tpu.pipeline_mode<synchronous>, transform_indices = @transform_1, window_bounds = array<i64: 16, 128>}, {pipeline_mode = #tpu.pipeline_mode<synchronous>, transform_indices = @transform_2, window_bounds = array<i64: 32, 128>}, {pipeline_mode = #tpu.pipeline_mode<synchronous>, transform_indices = @transform_3, window_bounds = array<i64: 1, 128>}, {pipeline_mode = #tpu.pipeline_mode<synchronous>, transform_indices = @transform_4, window_bounds = array<i64: 32, 128>}, {pipeline_mode = #tpu.pipeline_mode<synchronous>, transform_indices = @transform_5, window_bounds = array<i64: 32, 128>}, {pipeline_mode = #tpu.pipeline_mode<synchronous>, transform_indices = @transform_6, window_bounds = array<i64: 1, 128>}, {pipeline_mode = #tpu.pipeline_mode<synchronous>, transform_indices = @transform_7, window_bounds = array<i64: 32, 128>}, {pipeline_mode = #tpu.pipeline_mode<synchronous>, transform_indices = @transform_8, window_bounds = array<i64: 1, 128>}, {pipeline_mode = #tpu.pipeline_mode<synchronous>, transform_indices = @transform_9, window_bounds = array<i64: 64, 128>}]} {
    %c0 = arith.constant 0 : index
    %c0_0 = arith.constant 0 : index
    %0 = vector.load %arg1[%c0, %c0_0] : memref<64x16xf32, #tpu.memory_space<vmem>>, vector<64x16xf32>
    %c0_1 = arith.constant 0 : index
    %c0_2 = arith.constant 0 : index
    %1 = vector.load %arg2[%c0_1, %c0_2] : memref<16x128xbf16, #tpu.memory_space<vmem>>, vector<16x128xbf16>
    %c0_3 = arith.constant 0 : index
    %c0_4 = arith.constant 0 : index
    %2 = vector.load %arg3[%c0_3, %c0_4] : memref<32x128xbf16, #tpu.memory_space<vmem>>, vector<32x128xbf16>
    %c0_5 = arith.constant 0 : index
    %c0_6 = arith.constant 0 : index
    %3 = vector.load %arg4[%c0_5, %c0_6] : memref<1x128xf32, #tpu.memory_space<vmem>>, vector<1x128xf32>
    %4 = arith.truncf %0 : vector<64x16xf32> to vector<64x16xbf16>
    %cst = arith.constant dense<0.000000e+00> : vector<64x128xf32>
    %5 = tpu.matmul %4, %1, %cst {dimension_numbers = #tpu.dot_dimension_numbers<[1], [0], [0], [1], [0, 0, 1, 1], [], []>} : vector<64x16xbf16>, vector<16x128xbf16>, vector<64x128xf32> -> vector<64x128xf32>
    %6 = vector.broadcast %3 : vector<1x128xf32> to vector<64x128xf32>
    %7 = arith.addf %5, %6 : vector<64x128xf32>
    %cst_7 = arith.constant 0.000000e+00 : f32
    %8 = vector.broadcast %cst_7 : f32 to vector<8x32xf32>
    %cst_8 = arith.constant 0.000000e+00 : f32
    %9 = vector.broadcast %cst_8 : f32 to vector<8x32xf32>
    %10 = vector.extract_strided_slice %7 {offsets = [0, 0], sizes = [8, 128], strides = [1, 1]} : vector<64x128xf32> to vector<8x128xf32>
    %11 = arith.truncf %8 : vector<8x32xf32> to vector<8x32xbf16>
    %cst_9 = arith.constant dense<0.000000e+00> : vector<8x128xf32>
    %12 = tpu.matmul %11, %2, %cst_9 {dimension_numbers = #tpu.dot_dimension_numbers<[1], [0], [0], [1], [0, 0, 1, 1], [], []>} : vector<8x32xbf16>, vector<32x128xbf16>, vector<8x128xf32> -> vector<8x128xf32>
    %13 = arith.addf %10, %12 : vector<8x128xf32>
    %14 = math.tanh %13 : vector<8x128xf32>
    %15 = vector.extract_strided_slice %14 {offsets = [0, 0], sizes = [8, 32], strides = [1, 1]} : vector<8x128xf32> to vector<8x32xf32>
    %cst_10 = arith.constant 5.000000e-01 : f32
    %16 = vector.broadcast %cst_10 : f32 to vector<8x32xf32>
    %17 = arith.mulf %16, %15 : vector<8x32xf32>
    %cst_11 = arith.constant 5.000000e-01 : f32
    %18 = vector.broadcast %cst_11 : f32 to vector<8x32xf32>
    %19 = arith.addf %17, %18 : vector<8x32xf32>
    %20 = vector.extract_strided_slice %14 {offsets = [0, 32], sizes = [8, 32], strides = [1, 1]} : vector<8x128xf32> to vector<8x32xf32>
    %cst_12 = arith.constant 5.000000e-01 : f32
    %21 = vector.broadcast %cst_12 : f32 to vector<8x32xf32>
    %22 = arith.mulf %21, %20 : vector<8x32xf32>
    %cst_13 = arith.constant 5.000000e-01 : f32
    %23 = vector.broadcast %cst_13 : f32 to vector<8x32xf32>
    %24 = arith.addf %22, %23 : vector<8x32xf32>
    %25 = vector.extract_strided_slice %14 {offsets = [0, 64], sizes = [8, 32], strides = [1, 1]} : vector<8x128xf32> to vector<8x32xf32>
    %26 = vector.extract_strided_slice %14 {offsets = [0, 96], sizes = [8, 32], strides = [1, 1]} : vector<8x128xf32> to vector<8x32xf32>
    %cst_14 = arith.constant 5.000000e-01 : f32
    %27 = vector.broadcast %cst_14 : f32 to vector<8x32xf32>
    %28 = arith.mulf %27, %26 : vector<8x32xf32>
    %cst_15 = arith.constant 5.000000e-01 : f32
    %29 = vector.broadcast %cst_15 : f32 to vector<8x32xf32>
    %30 = arith.addf %28, %29 : vector<8x32xf32>
    %31 = arith.mulf %24, %9 : vector<8x32xf32>
    %32 = arith.mulf %19, %25 : vector<8x32xf32>
    %33 = arith.addf %31, %32 : vector<8x32xf32>
    %34 = math.tanh %33 : vector<8x32xf32>
    %35 = arith.mulf %30, %34 : vector<8x32xf32>
    %36 = vector.extract_strided_slice %7 {offsets = [8, 0], sizes = [8, 128], strides = [1, 1]} : vector<64x128xf32> to vector<8x128xf32>
    %37 = arith.truncf %35 : vector<8x32xf32> to vector<8x32xbf16>
    %cst_16 = arith.constant dense<0.000000e+00> : vector<8x128xf32>
    %38 = tpu.matmul %37, %2, %cst_16 {dimension_numbers = #tpu.dot_dimension_numbers<[1], [0], [0], [1], [0, 0, 1, 1], [], []>} : vector<8x32xbf16>, vector<32x128xbf16>, vector<8x128xf32> -> vector<8x128xf32>
    %39 = arith.addf %36, %38 : vector<8x128xf32>
    %40 = math.tanh %39 : vector<8x128xf32>
    %41 = vector.extract_strided_slice %40 {offsets = [0, 0], sizes = [8, 32], strides = [1, 1]} : vector<8x128xf32> to vector<8x32xf32>
    %cst_17 = arith.constant 5.000000e-01 : f32
    %42 = vector.broadcast %cst_17 : f32 to vector<8x32xf32>
    %43 = arith.mulf %42, %41 : vector<8x32xf32>
    %cst_18 = arith.constant 5.000000e-01 : f32
    %44 = vector.broadcast %cst_18 : f32 to vector<8x32xf32>
    %45 = arith.addf %43, %44 : vector<8x32xf32>
    %46 = vector.extract_strided_slice %40 {offsets = [0, 32], sizes = [8, 32], strides = [1, 1]} : vector<8x128xf32> to vector<8x32xf32>
    %cst_19 = arith.constant 5.000000e-01 : f32
    %47 = vector.broadcast %cst_19 : f32 to vector<8x32xf32>
    %48 = arith.mulf %47, %46 : vector<8x32xf32>
    %cst_20 = arith.constant 5.000000e-01 : f32
    %49 = vector.broadcast %cst_20 : f32 to vector<8x32xf32>
    %50 = arith.addf %48, %49 : vector<8x32xf32>
    %51 = vector.extract_strided_slice %40 {offsets = [0, 64], sizes = [8, 32], strides = [1, 1]} : vector<8x128xf32> to vector<8x32xf32>
    %52 = vector.extract_strided_slice %40 {offsets = [0, 96], sizes = [8, 32], strides = [1, 1]} : vector<8x128xf32> to vector<8x32xf32>
    %cst_21 = arith.constant 5.000000e-01 : f32
    %53 = vector.broadcast %cst_21 : f32 to vector<8x32xf32>
    %54 = arith.mulf %53, %52 : vector<8x32xf32>
    %cst_22 = arith.constant 5.000000e-01 : f32
    %55 = vector.broadcast %cst_22 : f32 to vector<8x32xf32>
    %56 = arith.addf %54, %55 : vector<8x32xf32>
    %57 = arith.mulf %50, %33 : vector<8x32xf32>
    %58 = arith.mulf %45, %51 : vector<8x32xf32>
    %59 = arith.addf %57, %58 : vector<8x32xf32>
    %60 = math.tanh %59 : vector<8x32xf32>
    %61 = arith.mulf %56, %60 : vector<8x32xf32>
    %62 = vector.extract_strided_slice %7 {offsets = [16, 0], sizes = [8, 128], strides = [1, 1]} : vector<64x128xf32> to vector<8x128xf32>
    %63 = arith.truncf %61 : vector<8x32xf32> to vector<8x32xbf16>
    %cst_23 = arith.constant dense<0.000000e+00> : vector<8x128xf32>
    %64 = tpu.matmul %63, %2, %cst_23 {dimension_numbers = #tpu.dot_dimension_numbers<[1], [0], [0], [1], [0, 0, 1, 1], [], []>} : vector<8x32xbf16>, vector<32x128xbf16>, vector<8x128xf32> -> vector<8x128xf32>
    %65 = arith.addf %62, %64 : vector<8x128xf32>
    %66 = math.tanh %65 : vector<8x128xf32>
    %67 = vector.extract_strided_slice %66 {offsets = [0, 0], sizes = [8, 32], strides = [1, 1]} : vector<8x128xf32> to vector<8x32xf32>
    %cst_24 = arith.constant 5.000000e-01 : f32
    %68 = vector.broadcast %cst_24 : f32 to vector<8x32xf32>
    %69 = arith.mulf %68, %67 : vector<8x32xf32>
    %cst_25 = arith.constant 5.000000e-01 : f32
    %70 = vector.broadcast %cst_25 : f32 to vector<8x32xf32>
    %71 = arith.addf %69, %70 : vector<8x32xf32>
    %72 = vector.extract_strided_slice %66 {offsets = [0, 32], sizes = [8, 32], strides = [1, 1]} : vector<8x128xf32> to vector<8x32xf32>
    %cst_26 = arith.constant 5.000000e-01 : f32
    %73 = vector.broadcast %cst_26 : f32 to vector<8x32xf32>
    %74 = arith.mulf %73, %72 : vector<8x32xf32>
    %cst_27 = arith.constant 5.000000e-01 : f32
    %75 = vector.broadcast %cst_27 : f32 to vector<8x32xf32>
    %76 = arith.addf %74, %75 : vector<8x32xf32>
    %77 = vector.extract_strided_slice %66 {offsets = [0, 64], sizes = [8, 32], strides = [1, 1]} : vector<8x128xf32> to vector<8x32xf32>
    %78 = vector.extract_strided_slice %66 {offsets = [0, 96], sizes = [8, 32], strides = [1, 1]} : vector<8x128xf32> to vector<8x32xf32>
    %cst_28 = arith.constant 5.000000e-01 : f32
    %79 = vector.broadcast %cst_28 : f32 to vector<8x32xf32>
    %80 = arith.mulf %79, %78 : vector<8x32xf32>
    %cst_29 = arith.constant 5.000000e-01 : f32
    %81 = vector.broadcast %cst_29 : f32 to vector<8x32xf32>
    %82 = arith.addf %80, %81 : vector<8x32xf32>
    %83 = arith.mulf %76, %59 : vector<8x32xf32>
    %84 = arith.mulf %71, %77 : vector<8x32xf32>
    %85 = arith.addf %83, %84 : vector<8x32xf32>
    %86 = math.tanh %85 : vector<8x32xf32>
    %87 = arith.mulf %82, %86 : vector<8x32xf32>
    %88 = vector.extract_strided_slice %7 {offsets = [24, 0], sizes = [8, 128], strides = [1, 1]} : vector<64x128xf32> to vector<8x128xf32>
    %89 = arith.truncf %87 : vector<8x32xf32> to vector<8x32xbf16>
    %cst_30 = arith.constant dense<0.000000e+00> : vector<8x128xf32>
    %90 = tpu.matmul %89, %2, %cst_30 {dimension_numbers = #tpu.dot_dimension_numbers<[1], [0], [0], [1], [0, 0, 1, 1], [], []>} : vector<8x32xbf16>, vector<32x128xbf16>, vector<8x128xf32> -> vector<8x128xf32>
    %91 = arith.addf %88, %90 : vector<8x128xf32>
    %92 = math.tanh %91 : vector<8x128xf32>
    %93 = vector.extract_strided_slice %92 {offsets = [0, 0], sizes = [8, 32], strides = [1, 1]} : vector<8x128xf32> to vector<8x32xf32>
    %cst_31 = arith.constant 5.000000e-01 : f32
    %94 = vector.broadcast %cst_31 : f32 to vector<8x32xf32>
    %95 = arith.mulf %94, %93 : vector<8x32xf32>
    %cst_32 = arith.constant 5.000000e-01 : f32
    %96 = vector.broadcast %cst_32 : f32 to vector<8x32xf32>
    %97 = arith.addf %95, %96 : vector<8x32xf32>
    %98 = vector.extract_strided_slice %92 {offsets = [0, 32], sizes = [8, 32], strides = [1, 1]} : vector<8x128xf32> to vector<8x32xf32>
    %cst_33 = arith.constant 5.000000e-01 : f32
    %99 = vector.broadcast %cst_33 : f32 to vector<8x32xf32>
    %100 = arith.mulf %99, %98 : vector<8x32xf32>
    %cst_34 = arith.constant 5.000000e-01 : f32
    %101 = vector.broadcast %cst_34 : f32 to vector<8x32xf32>
    %102 = arith.addf %100, %101 : vector<8x32xf32>
    %103 = vector.extract_strided_slice %92 {offsets = [0, 64], sizes = [8, 32], strides = [1, 1]} : vector<8x128xf32> to vector<8x32xf32>
    %104 = vector.extract_strided_slice %92 {offsets = [0, 96], sizes = [8, 32], strides = [1, 1]} : vector<8x128xf32> to vector<8x32xf32>
    %cst_35 = arith.constant 5.000000e-01 : f32
    %105 = vector.broadcast %cst_35 : f32 to vector<8x32xf32>
    %106 = arith.mulf %105, %104 : vector<8x32xf32>
    %cst_36 = arith.constant 5.000000e-01 : f32
    %107 = vector.broadcast %cst_36 : f32 to vector<8x32xf32>
    %108 = arith.addf %106, %107 : vector<8x32xf32>
    %109 = arith.mulf %102, %85 : vector<8x32xf32>
    %110 = arith.mulf %97, %103 : vector<8x32xf32>
    %111 = arith.addf %109, %110 : vector<8x32xf32>
    %112 = math.tanh %111 : vector<8x32xf32>
    %113 = arith.mulf %108, %112 : vector<8x32xf32>
    %114 = vector.extract_strided_slice %7 {offsets = [32, 0], sizes = [8, 128], strides = [1, 1]} : vector<64x128xf32> to vector<8x128xf32>
    %115 = arith.truncf %113 : vector<8x32xf32> to vector<8x32xbf16>
    %cst_37 = arith.constant dense<0.000000e+00> : vector<8x128xf32>
    %116 = tpu.matmul %115, %2, %cst_37 {dimension_numbers = #tpu.dot_dimension_numbers<[1], [0], [0], [1], [0, 0, 1, 1], [], []>} : vector<8x32xbf16>, vector<32x128xbf16>, vector<8x128xf32> -> vector<8x128xf32>
    %117 = arith.addf %114, %116 : vector<8x128xf32>
    %118 = math.tanh %117 : vector<8x128xf32>
    %119 = vector.extract_strided_slice %118 {offsets = [0, 0], sizes = [8, 32], strides = [1, 1]} : vector<8x128xf32> to vector<8x32xf32>
    %cst_38 = arith.constant 5.000000e-01 : f32
    %120 = vector.broadcast %cst_38 : f32 to vector<8x32xf32>
    %121 = arith.mulf %120, %119 : vector<8x32xf32>
    %cst_39 = arith.constant 5.000000e-01 : f32
    %122 = vector.broadcast %cst_39 : f32 to vector<8x32xf32>
    %123 = arith.addf %121, %122 : vector<8x32xf32>
    %124 = vector.extract_strided_slice %118 {offsets = [0, 32], sizes = [8, 32], strides = [1, 1]} : vector<8x128xf32> to vector<8x32xf32>
    %cst_40 = arith.constant 5.000000e-01 : f32
    %125 = vector.broadcast %cst_40 : f32 to vector<8x32xf32>
    %126 = arith.mulf %125, %124 : vector<8x32xf32>
    %cst_41 = arith.constant 5.000000e-01 : f32
    %127 = vector.broadcast %cst_41 : f32 to vector<8x32xf32>
    %128 = arith.addf %126, %127 : vector<8x32xf32>
    %129 = vector.extract_strided_slice %118 {offsets = [0, 64], sizes = [8, 32], strides = [1, 1]} : vector<8x128xf32> to vector<8x32xf32>
    %130 = vector.extract_strided_slice %118 {offsets = [0, 96], sizes = [8, 32], strides = [1, 1]} : vector<8x128xf32> to vector<8x32xf32>
    %cst_42 = arith.constant 5.000000e-01 : f32
    %131 = vector.broadcast %cst_42 : f32 to vector<8x32xf32>
    %132 = arith.mulf %131, %130 : vector<8x32xf32>
    %cst_43 = arith.constant 5.000000e-01 : f32
    %133 = vector.broadcast %cst_43 : f32 to vector<8x32xf32>
    %134 = arith.addf %132, %133 : vector<8x32xf32>
    %135 = arith.mulf %128, %111 : vector<8x32xf32>
    %136 = arith.mulf %123, %129 : vector<8x32xf32>
    %137 = arith.addf %135, %136 : vector<8x32xf32>
    %138 = math.tanh %137 : vector<8x32xf32>
    %139 = arith.mulf %134, %138 : vector<8x32xf32>
    %140 = vector.extract_strided_slice %7 {offsets = [40, 0], sizes = [8, 128], strides = [1, 1]} : vector<64x128xf32> to vector<8x128xf32>
    %141 = arith.truncf %139 : vector<8x32xf32> to vector<8x32xbf16>
    %cst_44 = arith.constant dense<0.000000e+00> : vector<8x128xf32>
    %142 = tpu.matmul %141, %2, %cst_44 {dimension_numbers = #tpu.dot_dimension_numbers<[1], [0], [0], [1], [0, 0, 1, 1], [], []>} : vector<8x32xbf16>, vector<32x128xbf16>, vector<8x128xf32> -> vector<8x128xf32>
    %143 = arith.addf %140, %142 : vector<8x128xf32>
    %144 = math.tanh %143 : vector<8x128xf32>
    %145 = vector.extract_strided_slice %144 {offsets = [0, 0], sizes = [8, 32], strides = [1, 1]} : vector<8x128xf32> to vector<8x32xf32>
    %cst_45 = arith.constant 5.000000e-01 : f32
    %146 = vector.broadcast %cst_45 : f32 to vector<8x32xf32>
    %147 = arith.mulf %146, %145 : vector<8x32xf32>
    %cst_46 = arith.constant 5.000000e-01 : f32
    %148 = vector.broadcast %cst_46 : f32 to vector<8x32xf32>
    %149 = arith.addf %147, %148 : vector<8x32xf32>
    %150 = vector.extract_strided_slice %144 {offsets = [0, 32], sizes = [8, 32], strides = [1, 1]} : vector<8x128xf32> to vector<8x32xf32>
    %cst_47 = arith.constant 5.000000e-01 : f32
    %151 = vector.broadcast %cst_47 : f32 to vector<8x32xf32>
    %152 = arith.mulf %151, %150 : vector<8x32xf32>
    %cst_48 = arith.constant 5.000000e-01 : f32
    %153 = vector.broadcast %cst_48 : f32 to vector<8x32xf32>
    %154 = arith.addf %152, %153 : vector<8x32xf32>
    %155 = vector.extract_strided_slice %144 {offsets = [0, 64], sizes = [8, 32], strides = [1, 1]} : vector<8x128xf32> to vector<8x32xf32>
    %156 = vector.extract_strided_slice %144 {offsets = [0, 96], sizes = [8, 32], strides = [1, 1]} : vector<8x128xf32> to vector<8x32xf32>
    %cst_49 = arith.constant 5.000000e-01 : f32
    %157 = vector.broadcast %cst_49 : f32 to vector<8x32xf32>
    %158 = arith.mulf %157, %156 : vector<8x32xf32>
    %cst_50 = arith.constant 5.000000e-01 : f32
    %159 = vector.broadcast %cst_50 : f32 to vector<8x32xf32>
    %160 = arith.addf %158, %159 : vector<8x32xf32>
    %161 = arith.mulf %154, %137 : vector<8x32xf32>
    %162 = arith.mulf %149, %155 : vector<8x32xf32>
    %163 = arith.addf %161, %162 : vector<8x32xf32>
    %164 = math.tanh %163 : vector<8x32xf32>
    %165 = arith.mulf %160, %164 : vector<8x32xf32>
    %166 = vector.extract_strided_slice %7 {offsets = [48, 0], sizes = [8, 128], strides = [1, 1]} : vector<64x128xf32> to vector<8x128xf32>
    %167 = arith.truncf %165 : vector<8x32xf32> to vector<8x32xbf16>
    %cst_51 = arith.constant dense<0.000000e+00> : vector<8x128xf32>
    %168 = tpu.matmul %167, %2, %cst_51 {dimension_numbers = #tpu.dot_dimension_numbers<[1], [0], [0], [1], [0, 0, 1, 1], [], []>} : vector<8x32xbf16>, vector<32x128xbf16>, vector<8x128xf32> -> vector<8x128xf32>
    %169 = arith.addf %166, %168 : vector<8x128xf32>
    %170 = math.tanh %169 : vector<8x128xf32>
    %171 = vector.extract_strided_slice %170 {offsets = [0, 0], sizes = [8, 32], strides = [1, 1]} : vector<8x128xf32> to vector<8x32xf32>
    %cst_52 = arith.constant 5.000000e-01 : f32
    %172 = vector.broadcast %cst_52 : f32 to vector<8x32xf32>
    %173 = arith.mulf %172, %171 : vector<8x32xf32>
    %cst_53 = arith.constant 5.000000e-01 : f32
    %174 = vector.broadcast %cst_53 : f32 to vector<8x32xf32>
    %175 = arith.addf %173, %174 : vector<8x32xf32>
    %176 = vector.extract_strided_slice %170 {offsets = [0, 32], sizes = [8, 32], strides = [1, 1]} : vector<8x128xf32> to vector<8x32xf32>
    %cst_54 = arith.constant 5.000000e-01 : f32
    %177 = vector.broadcast %cst_54 : f32 to vector<8x32xf32>
    %178 = arith.mulf %177, %176 : vector<8x32xf32>
    %cst_55 = arith.constant 5.000000e-01 : f32
    %179 = vector.broadcast %cst_55 : f32 to vector<8x32xf32>
    %180 = arith.addf %178, %179 : vector<8x32xf32>
    %181 = vector.extract_strided_slice %170 {offsets = [0, 64], sizes = [8, 32], strides = [1, 1]} : vector<8x128xf32> to vector<8x32xf32>
    %182 = vector.extract_strided_slice %170 {offsets = [0, 96], sizes = [8, 32], strides = [1, 1]} : vector<8x128xf32> to vector<8x32xf32>
    %cst_56 = arith.constant 5.000000e-01 : f32
    %183 = vector.broadcast %cst_56 : f32 to vector<8x32xf32>
    %184 = arith.mulf %183, %182 : vector<8x32xf32>
    %cst_57 = arith.constant 5.000000e-01 : f32
    %185 = vector.broadcast %cst_57 : f32 to vector<8x32xf32>
    %186 = arith.addf %184, %185 : vector<8x32xf32>
    %187 = arith.mulf %180, %163 : vector<8x32xf32>
    %188 = arith.mulf %175, %181 : vector<8x32xf32>
    %189 = arith.addf %187, %188 : vector<8x32xf32>
    %190 = math.tanh %189 : vector<8x32xf32>
    %191 = arith.mulf %186, %190 : vector<8x32xf32>
    %192 = vector.extract_strided_slice %7 {offsets = [56, 0], sizes = [8, 128], strides = [1, 1]} : vector<64x128xf32> to vector<8x128xf32>
    %193 = arith.truncf %191 : vector<8x32xf32> to vector<8x32xbf16>
    %cst_58 = arith.constant dense<0.000000e+00> : vector<8x128xf32>
    %194 = tpu.matmul %193, %2, %cst_58 {dimension_numbers = #tpu.dot_dimension_numbers<[1], [0], [0], [1], [0, 0, 1, 1], [], []>} : vector<8x32xbf16>, vector<32x128xbf16>, vector<8x128xf32> -> vector<8x128xf32>
    %195 = arith.addf %192, %194 : vector<8x128xf32>
    %196 = math.tanh %195 : vector<8x128xf32>
    %197 = vector.extract_strided_slice %196 {offsets = [0, 0], sizes = [8, 32], strides = [1, 1]} : vector<8x128xf32> to vector<8x32xf32>
    %cst_59 = arith.constant 5.000000e-01 : f32
    %198 = vector.broadcast %cst_59 : f32 to vector<8x32xf32>
    %199 = arith.mulf %198, %197 : vector<8x32xf32>
    %cst_60 = arith.constant 5.000000e-01 : f32
    %200 = vector.broadcast %cst_60 : f32 to vector<8x32xf32>
    %201 = arith.addf %199, %200 : vector<8x32xf32>
    %202 = vector.extract_strided_slice %196 {offsets = [0, 32], sizes = [8, 32], strides = [1, 1]} : vector<8x128xf32> to vector<8x32xf32>
    %cst_61 = arith.constant 5.000000e-01 : f32
    %203 = vector.broadcast %cst_61 : f32 to vector<8x32xf32>
    %204 = arith.mulf %203, %202 : vector<8x32xf32>
    %cst_62 = arith.constant 5.000000e-01 : f32
    %205 = vector.broadcast %cst_62 : f32 to vector<8x32xf32>
    %206 = arith.addf %204, %205 : vector<8x32xf32>
    %207 = vector.extract_strided_slice %196 {offsets = [0, 64], sizes = [8, 32], strides = [1, 1]} : vector<8x128xf32> to vector<8x32xf32>
    %208 = vector.extract_strided_slice %196 {offsets = [0, 96], sizes = [8, 32], strides = [1, 1]} : vector<8x128xf32> to vector<8x32xf32>
    %cst_63 = arith.constant 5.000000e-01 : f32
    %209 = vector.broadcast %cst_63 : f32 to vector<8x32xf32>
    %210 = arith.mulf %209, %208 : vector<8x32xf32>
    %cst_64 = arith.constant 5.000000e-01 : f32
    %211 = vector.broadcast %cst_64 : f32 to vector<8x32xf32>
    %212 = arith.addf %210, %211 : vector<8x32xf32>
    %213 = arith.mulf %206, %189 : vector<8x32xf32>
    %214 = arith.mulf %201, %207 : vector<8x32xf32>
    %215 = arith.addf %213, %214 : vector<8x32xf32>
    %216 = math.tanh %215 : vector<8x32xf32>
    %217 = arith.mulf %212, %216 : vector<8x32xf32>
    %218 = tpu.concatenate %35, %61, %87, %113, %139, %165, %191, %217 in 0 : vector<8x32xf32>, vector<8x32xf32>, vector<8x32xf32>, vector<8x32xf32>, vector<8x32xf32>, vector<8x32xf32>, vector<8x32xf32>, vector<8x32xf32> -> vector<64x32xf32>
    %c0_65 = arith.constant 0 : index
    %c0_66 = arith.constant 0 : index
    %219 = vector.load %arg5[%c0_65, %c0_66] : memref<32x128xbf16, #tpu.memory_space<vmem>>, vector<32x128xbf16>
    %c0_67 = arith.constant 0 : index
    %c0_68 = arith.constant 0 : index
    %220 = vector.load %arg6[%c0_67, %c0_68] : memref<32x128xbf16, #tpu.memory_space<vmem>>, vector<32x128xbf16>
    %c0_69 = arith.constant 0 : index
    %c0_70 = arith.constant 0 : index
    %221 = vector.load %arg7[%c0_69, %c0_70] : memref<1x128xf32, #tpu.memory_space<vmem>>, vector<1x128xf32>
    %222 = arith.truncf %218 : vector<64x32xf32> to vector<64x32xbf16>
    %cst_71 = arith.constant dense<0.000000e+00> : vector<64x128xf32>
    %223 = tpu.matmul %222, %219, %cst_71 {dimension_numbers = #tpu.dot_dimension_numbers<[1], [0], [0], [1], [0, 0, 1, 1], [], []>} : vector<64x32xbf16>, vector<32x128xbf16>, vector<64x128xf32> -> vector<64x128xf32>
    %224 = vector.broadcast %221 : vector<1x128xf32> to vector<64x128xf32>
    %225 = arith.addf %223, %224 : vector<64x128xf32>
    %cst_72 = arith.constant 0.000000e+00 : f32
    %226 = vector.broadcast %cst_72 : f32 to vector<8x32xf32>
    %cst_73 = arith.constant 0.000000e+00 : f32
    %227 = vector.broadcast %cst_73 : f32 to vector<8x32xf32>
    %228 = vector.extract_strided_slice %225 {offsets = [0, 0], sizes = [8, 128], strides = [1, 1]} : vector<64x128xf32> to vector<8x128xf32>
    %229 = arith.truncf %226 : vector<8x32xf32> to vector<8x32xbf16>
    %cst_74 = arith.constant dense<0.000000e+00> : vector<8x128xf32>
    %230 = tpu.matmul %229, %220, %cst_74 {dimension_numbers = #tpu.dot_dimension_numbers<[1], [0], [0], [1], [0, 0, 1, 1], [], []>} : vector<8x32xbf16>, vector<32x128xbf16>, vector<8x128xf32> -> vector<8x128xf32>
    %231 = arith.addf %228, %230 : vector<8x128xf32>
    %232 = math.tanh %231 : vector<8x128xf32>
    %233 = vector.extract_strided_slice %232 {offsets = [0, 0], sizes = [8, 32], strides = [1, 1]} : vector<8x128xf32> to vector<8x32xf32>
    %cst_75 = arith.constant 5.000000e-01 : f32
    %234 = vector.broadcast %cst_75 : f32 to vector<8x32xf32>
    %235 = arith.mulf %234, %233 : vector<8x32xf32>
    %cst_76 = arith.constant 5.000000e-01 : f32
    %236 = vector.broadcast %cst_76 : f32 to vector<8x32xf32>
    %237 = arith.addf %235, %236 : vector<8x32xf32>
    %238 = vector.extract_strided_slice %232 {offsets = [0, 32], sizes = [8, 32], strides = [1, 1]} : vector<8x128xf32> to vector<8x32xf32>
    %cst_77 = arith.constant 5.000000e-01 : f32
    %239 = vector.broadcast %cst_77 : f32 to vector<8x32xf32>
    %240 = arith.mulf %239, %238 : vector<8x32xf32>
    %cst_78 = arith.constant 5.000000e-01 : f32
    %241 = vector.broadcast %cst_78 : f32 to vector<8x32xf32>
    %242 = arith.addf %240, %241 : vector<8x32xf32>
    %243 = vector.extract_strided_slice %232 {offsets = [0, 64], sizes = [8, 32], strides = [1, 1]} : vector<8x128xf32> to vector<8x32xf32>
    %244 = vector.extract_strided_slice %232 {offsets = [0, 96], sizes = [8, 32], strides = [1, 1]} : vector<8x128xf32> to vector<8x32xf32>
    %cst_79 = arith.constant 5.000000e-01 : f32
    %245 = vector.broadcast %cst_79 : f32 to vector<8x32xf32>
    %246 = arith.mulf %245, %244 : vector<8x32xf32>
    %cst_80 = arith.constant 5.000000e-01 : f32
    %247 = vector.broadcast %cst_80 : f32 to vector<8x32xf32>
    %248 = arith.addf %246, %247 : vector<8x32xf32>
    %249 = arith.mulf %242, %227 : vector<8x32xf32>
    %250 = arith.mulf %237, %243 : vector<8x32xf32>
    %251 = arith.addf %249, %250 : vector<8x32xf32>
    %252 = math.tanh %251 : vector<8x32xf32>
    %253 = arith.mulf %248, %252 : vector<8x32xf32>
    %254 = vector.extract_strided_slice %225 {offsets = [8, 0], sizes = [8, 128], strides = [1, 1]} : vector<64x128xf32> to vector<8x128xf32>
    %255 = arith.truncf %253 : vector<8x32xf32> to vector<8x32xbf16>
    %cst_81 = arith.constant dense<0.000000e+00> : vector<8x128xf32>
    %256 = tpu.matmul %255, %220, %cst_81 {dimension_numbers = #tpu.dot_dimension_numbers<[1], [0], [0], [1], [0, 0, 1, 1], [], []>} : vector<8x32xbf16>, vector<32x128xbf16>, vector<8x128xf32> -> vector<8x128xf32>
    %257 = arith.addf %254, %256 : vector<8x128xf32>
    %258 = math.tanh %257 : vector<8x128xf32>
    %259 = vector.extract_strided_slice %258 {offsets = [0, 0], sizes = [8, 32], strides = [1, 1]} : vector<8x128xf32> to vector<8x32xf32>
    %cst_82 = arith.constant 5.000000e-01 : f32
    %260 = vector.broadcast %cst_82 : f32 to vector<8x32xf32>
    %261 = arith.mulf %260, %259 : vector<8x32xf32>
    %cst_83 = arith.constant 5.000000e-01 : f32
    %262 = vector.broadcast %cst_83 : f32 to vector<8x32xf32>
    %263 = arith.addf %261, %262 : vector<8x32xf32>
    %264 = vector.extract_strided_slice %258 {offsets = [0, 32], sizes = [8, 32], strides = [1, 1]} : vector<8x128xf32> to vector<8x32xf32>
    %cst_84 = arith.constant 5.000000e-01 : f32
    %265 = vector.broadcast %cst_84 : f32 to vector<8x32xf32>
    %266 = arith.mulf %265, %264 : vector<8x32xf32>
    %cst_85 = arith.constant 5.000000e-01 : f32
    %267 = vector.broadcast %cst_85 : f32 to vector<8x32xf32>
    %268 = arith.addf %266, %267 : vector<8x32xf32>
    %269 = vector.extract_strided_slice %258 {offsets = [0, 64], sizes = [8, 32], strides = [1, 1]} : vector<8x128xf32> to vector<8x32xf32>
    %270 = vector.extract_strided_slice %258 {offsets = [0, 96], sizes = [8, 32], strides = [1, 1]} : vector<8x128xf32> to vector<8x32xf32>
    %cst_86 = arith.constant 5.000000e-01 : f32
    %271 = vector.broadcast %cst_86 : f32 to vector<8x32xf32>
    %272 = arith.mulf %271, %270 : vector<8x32xf32>
    %cst_87 = arith.constant 5.000000e-01 : f32
    %273 = vector.broadcast %cst_87 : f32 to vector<8x32xf32>
    %274 = arith.addf %272, %273 : vector<8x32xf32>
    %275 = arith.mulf %268, %251 : vector<8x32xf32>
    %276 = arith.mulf %263, %269 : vector<8x32xf32>
    %277 = arith.addf %275, %276 : vector<8x32xf32>
    %278 = math.tanh %277 : vector<8x32xf32>
    %279 = arith.mulf %274, %278 : vector<8x32xf32>
    %280 = vector.extract_strided_slice %225 {offsets = [16, 0], sizes = [8, 128], strides = [1, 1]} : vector<64x128xf32> to vector<8x128xf32>
    %281 = arith.truncf %279 : vector<8x32xf32> to vector<8x32xbf16>
    %cst_88 = arith.constant dense<0.000000e+00> : vector<8x128xf32>
    %282 = tpu.matmul %281, %220, %cst_88 {dimension_numbers = #tpu.dot_dimension_numbers<[1], [0], [0], [1], [0, 0, 1, 1], [], []>} : vector<8x32xbf16>, vector<32x128xbf16>, vector<8x128xf32> -> vector<8x128xf32>
    %283 = arith.addf %280, %282 : vector<8x128xf32>
    %284 = math.tanh %283 : vector<8x128xf32>
    %285 = vector.extract_strided_slice %284 {offsets = [0, 0], sizes = [8, 32], strides = [1, 1]} : vector<8x128xf32> to vector<8x32xf32>
    %cst_89 = arith.constant 5.000000e-01 : f32
    %286 = vector.broadcast %cst_89 : f32 to vector<8x32xf32>
    %287 = arith.mulf %286, %285 : vector<8x32xf32>
    %cst_90 = arith.constant 5.000000e-01 : f32
    %288 = vector.broadcast %cst_90 : f32 to vector<8x32xf32>
    %289 = arith.addf %287, %288 : vector<8x32xf32>
    %290 = vector.extract_strided_slice %284 {offsets = [0, 32], sizes = [8, 32], strides = [1, 1]} : vector<8x128xf32> to vector<8x32xf32>
    %cst_91 = arith.constant 5.000000e-01 : f32
    %291 = vector.broadcast %cst_91 : f32 to vector<8x32xf32>
    %292 = arith.mulf %291, %290 : vector<8x32xf32>
    %cst_92 = arith.constant 5.000000e-01 : f32
    %293 = vector.broadcast %cst_92 : f32 to vector<8x32xf32>
    %294 = arith.addf %292, %293 : vector<8x32xf32>
    %295 = vector.extract_strided_slice %284 {offsets = [0, 64], sizes = [8, 32], strides = [1, 1]} : vector<8x128xf32> to vector<8x32xf32>
    %296 = vector.extract_strided_slice %284 {offsets = [0, 96], sizes = [8, 32], strides = [1, 1]} : vector<8x128xf32> to vector<8x32xf32>
    %cst_93 = arith.constant 5.000000e-01 : f32
    %297 = vector.broadcast %cst_93 : f32 to vector<8x32xf32>
    %298 = arith.mulf %297, %296 : vector<8x32xf32>
    %cst_94 = arith.constant 5.000000e-01 : f32
    %299 = vector.broadcast %cst_94 : f32 to vector<8x32xf32>
    %300 = arith.addf %298, %299 : vector<8x32xf32>
    %301 = arith.mulf %294, %277 : vector<8x32xf32>
    %302 = arith.mulf %289, %295 : vector<8x32xf32>
    %303 = arith.addf %301, %302 : vector<8x32xf32>
    %304 = math.tanh %303 : vector<8x32xf32>
    %305 = arith.mulf %300, %304 : vector<8x32xf32>
    %306 = vector.extract_strided_slice %225 {offsets = [24, 0], sizes = [8, 128], strides = [1, 1]} : vector<64x128xf32> to vector<8x128xf32>
    %307 = arith.truncf %305 : vector<8x32xf32> to vector<8x32xbf16>
    %cst_95 = arith.constant dense<0.000000e+00> : vector<8x128xf32>
    %308 = tpu.matmul %307, %220, %cst_95 {dimension_numbers = #tpu.dot_dimension_numbers<[1], [0], [0], [1], [0, 0, 1, 1], [], []>} : vector<8x32xbf16>, vector<32x128xbf16>, vector<8x128xf32> -> vector<8x128xf32>
    %309 = arith.addf %306, %308 : vector<8x128xf32>
    %310 = math.tanh %309 : vector<8x128xf32>
    %311 = vector.extract_strided_slice %310 {offsets = [0, 0], sizes = [8, 32], strides = [1, 1]} : vector<8x128xf32> to vector<8x32xf32>
    %cst_96 = arith.constant 5.000000e-01 : f32
    %312 = vector.broadcast %cst_96 : f32 to vector<8x32xf32>
    %313 = arith.mulf %312, %311 : vector<8x32xf32>
    %cst_97 = arith.constant 5.000000e-01 : f32
    %314 = vector.broadcast %cst_97 : f32 to vector<8x32xf32>
    %315 = arith.addf %313, %314 : vector<8x32xf32>
    %316 = vector.extract_strided_slice %310 {offsets = [0, 32], sizes = [8, 32], strides = [1, 1]} : vector<8x128xf32> to vector<8x32xf32>
    %cst_98 = arith.constant 5.000000e-01 : f32
    %317 = vector.broadcast %cst_98 : f32 to vector<8x32xf32>
    %318 = arith.mulf %317, %316 : vector<8x32xf32>
    %cst_99 = arith.constant 5.000000e-01 : f32
    %319 = vector.broadcast %cst_99 : f32 to vector<8x32xf32>
    %320 = arith.addf %318, %319 : vector<8x32xf32>
    %321 = vector.extract_strided_slice %310 {offsets = [0, 64], sizes = [8, 32], strides = [1, 1]} : vector<8x128xf32> to vector<8x32xf32>
    %322 = vector.extract_strided_slice %310 {offsets = [0, 96], sizes = [8, 32], strides = [1, 1]} : vector<8x128xf32> to vector<8x32xf32>
    %cst_100 = arith.constant 5.000000e-01 : f32
    %323 = vector.broadcast %cst_100 : f32 to vector<8x32xf32>
    %324 = arith.mulf %323, %322 : vector<8x32xf32>
    %cst_101 = arith.constant 5.000000e-01 : f32
    %325 = vector.broadcast %cst_101 : f32 to vector<8x32xf32>
    %326 = arith.addf %324, %325 : vector<8x32xf32>
    %327 = arith.mulf %320, %303 : vector<8x32xf32>
    %328 = arith.mulf %315, %321 : vector<8x32xf32>
    %329 = arith.addf %327, %328 : vector<8x32xf32>
    %330 = math.tanh %329 : vector<8x32xf32>
    %331 = arith.mulf %326, %330 : vector<8x32xf32>
    %332 = vector.extract_strided_slice %225 {offsets = [32, 0], sizes = [8, 128], strides = [1, 1]} : vector<64x128xf32> to vector<8x128xf32>
    %333 = arith.truncf %331 : vector<8x32xf32> to vector<8x32xbf16>
    %cst_102 = arith.constant dense<0.000000e+00> : vector<8x128xf32>
    %334 = tpu.matmul %333, %220, %cst_102 {dimension_numbers = #tpu.dot_dimension_numbers<[1], [0], [0], [1], [0, 0, 1, 1], [], []>} : vector<8x32xbf16>, vector<32x128xbf16>, vector<8x128xf32> -> vector<8x128xf32>
    %335 = arith.addf %332, %334 : vector<8x128xf32>
    %336 = math.tanh %335 : vector<8x128xf32>
    %337 = vector.extract_strided_slice %336 {offsets = [0, 0], sizes = [8, 32], strides = [1, 1]} : vector<8x128xf32> to vector<8x32xf32>
    %cst_103 = arith.constant 5.000000e-01 : f32
    %338 = vector.broadcast %cst_103 : f32 to vector<8x32xf32>
    %339 = arith.mulf %338, %337 : vector<8x32xf32>
    %cst_104 = arith.constant 5.000000e-01 : f32
    %340 = vector.broadcast %cst_104 : f32 to vector<8x32xf32>
    %341 = arith.addf %339, %340 : vector<8x32xf32>
    %342 = vector.extract_strided_slice %336 {offsets = [0, 32], sizes = [8, 32], strides = [1, 1]} : vector<8x128xf32> to vector<8x32xf32>
    %cst_105 = arith.constant 5.000000e-01 : f32
    %343 = vector.broadcast %cst_105 : f32 to vector<8x32xf32>
    %344 = arith.mulf %343, %342 : vector<8x32xf32>
    %cst_106 = arith.constant 5.000000e-01 : f32
    %345 = vector.broadcast %cst_106 : f32 to vector<8x32xf32>
    %346 = arith.addf %344, %345 : vector<8x32xf32>
    %347 = vector.extract_strided_slice %336 {offsets = [0, 64], sizes = [8, 32], strides = [1, 1]} : vector<8x128xf32> to vector<8x32xf32>
    %348 = vector.extract_strided_slice %336 {offsets = [0, 96], sizes = [8, 32], strides = [1, 1]} : vector<8x128xf32> to vector<8x32xf32>
    %cst_107 = arith.constant 5.000000e-01 : f32
    %349 = vector.broadcast %cst_107 : f32 to vector<8x32xf32>
    %350 = arith.mulf %349, %348 : vector<8x32xf32>
    %cst_108 = arith.constant 5.000000e-01 : f32
    %351 = vector.broadcast %cst_108 : f32 to vector<8x32xf32>
    %352 = arith.addf %350, %351 : vector<8x32xf32>
    %353 = arith.mulf %346, %329 : vector<8x32xf32>
    %354 = arith.mulf %341, %347 : vector<8x32xf32>
    %355 = arith.addf %353, %354 : vector<8x32xf32>
    %356 = math.tanh %355 : vector<8x32xf32>
    %357 = arith.mulf %352, %356 : vector<8x32xf32>
    %358 = vector.extract_strided_slice %225 {offsets = [40, 0], sizes = [8, 128], strides = [1, 1]} : vector<64x128xf32> to vector<8x128xf32>
    %359 = arith.truncf %357 : vector<8x32xf32> to vector<8x32xbf16>
    %cst_109 = arith.constant dense<0.000000e+00> : vector<8x128xf32>
    %360 = tpu.matmul %359, %220, %cst_109 {dimension_numbers = #tpu.dot_dimension_numbers<[1], [0], [0], [1], [0, 0, 1, 1], [], []>} : vector<8x32xbf16>, vector<32x128xbf16>, vector<8x128xf32> -> vector<8x128xf32>
    %361 = arith.addf %358, %360 : vector<8x128xf32>
    %362 = math.tanh %361 : vector<8x128xf32>
    %363 = vector.extract_strided_slice %362 {offsets = [0, 0], sizes = [8, 32], strides = [1, 1]} : vector<8x128xf32> to vector<8x32xf32>
    %cst_110 = arith.constant 5.000000e-01 : f32
    %364 = vector.broadcast %cst_110 : f32 to vector<8x32xf32>
    %365 = arith.mulf %364, %363 : vector<8x32xf32>
    %cst_111 = arith.constant 5.000000e-01 : f32
    %366 = vector.broadcast %cst_111 : f32 to vector<8x32xf32>
    %367 = arith.addf %365, %366 : vector<8x32xf32>
    %368 = vector.extract_strided_slice %362 {offsets = [0, 32], sizes = [8, 32], strides = [1, 1]} : vector<8x128xf32> to vector<8x32xf32>
    %cst_112 = arith.constant 5.000000e-01 : f32
    %369 = vector.broadcast %cst_112 : f32 to vector<8x32xf32>
    %370 = arith.mulf %369, %368 : vector<8x32xf32>
    %cst_113 = arith.constant 5.000000e-01 : f32
    %371 = vector.broadcast %cst_113 : f32 to vector<8x32xf32>
    %372 = arith.addf %370, %371 : vector<8x32xf32>
    %373 = vector.extract_strided_slice %362 {offsets = [0, 64], sizes = [8, 32], strides = [1, 1]} : vector<8x128xf32> to vector<8x32xf32>
    %374 = vector.extract_strided_slice %362 {offsets = [0, 96], sizes = [8, 32], strides = [1, 1]} : vector<8x128xf32> to vector<8x32xf32>
    %cst_114 = arith.constant 5.000000e-01 : f32
    %375 = vector.broadcast %cst_114 : f32 to vector<8x32xf32>
    %376 = arith.mulf %375, %374 : vector<8x32xf32>
    %cst_115 = arith.constant 5.000000e-01 : f32
    %377 = vector.broadcast %cst_115 : f32 to vector<8x32xf32>
    %378 = arith.addf %376, %377 : vector<8x32xf32>
    %379 = arith.mulf %372, %355 : vector<8x32xf32>
    %380 = arith.mulf %367, %373 : vector<8x32xf32>
    %381 = arith.addf %379, %380 : vector<8x32xf32>
    %382 = math.tanh %381 : vector<8x32xf32>
    %383 = arith.mulf %378, %382 : vector<8x32xf32>
    %384 = vector.extract_strided_slice %225 {offsets = [48, 0], sizes = [8, 128], strides = [1, 1]} : vector<64x128xf32> to vector<8x128xf32>
    %385 = arith.truncf %383 : vector<8x32xf32> to vector<8x32xbf16>
    %cst_116 = arith.constant dense<0.000000e+00> : vector<8x128xf32>
    %386 = tpu.matmul %385, %220, %cst_116 {dimension_numbers = #tpu.dot_dimension_numbers<[1], [0], [0], [1], [0, 0, 1, 1], [], []>} : vector<8x32xbf16>, vector<32x128xbf16>, vector<8x128xf32> -> vector<8x128xf32>
    %387 = arith.addf %384, %386 : vector<8x128xf32>
    %388 = math.tanh %387 : vector<8x128xf32>
    %389 = vector.extract_strided_slice %388 {offsets = [0, 0], sizes = [8, 32], strides = [1, 1]} : vector<8x128xf32> to vector<8x32xf32>
    %cst_117 = arith.constant 5.000000e-01 : f32
    %390 = vector.broadcast %cst_117 : f32 to vector<8x32xf32>
    %391 = arith.mulf %390, %389 : vector<8x32xf32>
    %cst_118 = arith.constant 5.000000e-01 : f32
    %392 = vector.broadcast %cst_118 : f32 to vector<8x32xf32>
    %393 = arith.addf %391, %392 : vector<8x32xf32>
    %394 = vector.extract_strided_slice %388 {offsets = [0, 32], sizes = [8, 32], strides = [1, 1]} : vector<8x128xf32> to vector<8x32xf32>
    %cst_119 = arith.constant 5.000000e-01 : f32
    %395 = vector.broadcast %cst_119 : f32 to vector<8x32xf32>
    %396 = arith.mulf %395, %394 : vector<8x32xf32>
    %cst_120 = arith.constant 5.000000e-01 : f32
    %397 = vector.broadcast %cst_120 : f32 to vector<8x32xf32>
    %398 = arith.addf %396, %397 : vector<8x32xf32>
    %399 = vector.extract_strided_slice %388 {offsets = [0, 64], sizes = [8, 32], strides = [1, 1]} : vector<8x128xf32> to vector<8x32xf32>
    %400 = vector.extract_strided_slice %388 {offsets = [0, 96], sizes = [8, 32], strides = [1, 1]} : vector<8x128xf32> to vector<8x32xf32>
    %cst_121 = arith.constant 5.000000e-01 : f32
    %401 = vector.broadcast %cst_121 : f32 to vector<8x32xf32>
    %402 = arith.mulf %401, %400 : vector<8x32xf32>
    %cst_122 = arith.constant 5.000000e-01 : f32
    %403 = vector.broadcast %cst_122 : f32 to vector<8x32xf32>
    %404 = arith.addf %402, %403 : vector<8x32xf32>
    %405 = arith.mulf %398, %381 : vector<8x32xf32>
    %406 = arith.mulf %393, %399 : vector<8x32xf32>
    %407 = arith.addf %405, %406 : vector<8x32xf32>
    %408 = math.tanh %407 : vector<8x32xf32>
    %409 = arith.mulf %404, %408 : vector<8x32xf32>
    %410 = vector.extract_strided_slice %225 {offsets = [56, 0], sizes = [8, 128], strides = [1, 1]} : vector<64x128xf32> to vector<8x128xf32>
    %411 = arith.truncf %409 : vector<8x32xf32> to vector<8x32xbf16>
    %cst_123 = arith.constant dense<0.000000e+00> : vector<8x128xf32>
    %412 = tpu.matmul %411, %220, %cst_123 {dimension_numbers = #tpu.dot_dimension_numbers<[1], [0], [0], [1], [0, 0, 1, 1], [], []>} : vector<8x32xbf16>, vector<32x128xbf16>, vector<8x128xf32> -> vector<8x128xf32>
    %413 = arith.addf %410, %412 : vector<8x128xf32>
    %414 = math.tanh %413 : vector<8x128xf32>
    %415 = vector.extract_strided_slice %414 {offsets = [0, 0], sizes = [8, 32], strides = [1, 1]} : vector<8x128xf32> to vector<8x32xf32>
    %cst_124 = arith.constant 5.000000e-01 : f32
    %416 = vector.broadcast %cst_124 : f32 to vector<8x32xf32>
    %417 = arith.mulf %416, %415 : vector<8x32xf32>
    %cst_125 = arith.constant 5.000000e-01 : f32
    %418 = vector.broadcast %cst_125 : f32 to vector<8x32xf32>
    %419 = arith.addf %417, %418 : vector<8x32xf32>
    %420 = vector.extract_strided_slice %414 {offsets = [0, 32], sizes = [8, 32], strides = [1, 1]} : vector<8x128xf32> to vector<8x32xf32>
    %cst_126 = arith.constant 5.000000e-01 : f32
    %421 = vector.broadcast %cst_126 : f32 to vector<8x32xf32>
    %422 = arith.mulf %421, %420 : vector<8x32xf32>
    %cst_127 = arith.constant 5.000000e-01 : f32
    %423 = vector.broadcast %cst_127 : f32 to vector<8x32xf32>
    %424 = arith.addf %422, %423 : vector<8x32xf32>
    %425 = vector.extract_strided_slice %414 {offsets = [0, 64], sizes = [8, 32], strides = [1, 1]} : vector<8x128xf32> to vector<8x32xf32>
    %426 = vector.extract_strided_slice %414 {offsets = [0, 96], sizes = [8, 32], strides = [1, 1]} : vector<8x128xf32> to vector<8x32xf32>
    %cst_128 = arith.constant 5.000000e-01 : f32
    %427 = vector.broadcast %cst_128 : f32 to vector<8x32xf32>
    %428 = arith.mulf %427, %426 : vector<8x32xf32>
    %cst_129 = arith.constant 5.000000e-01 : f32
    %429 = vector.broadcast %cst_129 : f32 to vector<8x32xf32>
    %430 = arith.addf %428, %429 : vector<8x32xf32>
    %431 = arith.mulf %424, %407 : vector<8x32xf32>
    %432 = arith.mulf %419, %425 : vector<8x32xf32>
    %433 = arith.addf %431, %432 : vector<8x32xf32>
    %434 = math.tanh %433 : vector<8x32xf32>
    %435 = arith.mulf %430, %434 : vector<8x32xf32>
    %436 = tpu.concatenate %253, %279, %305, %331, %357, %383, %409, %435 in 0 : vector<8x32xf32>, vector<8x32xf32>, vector<8x32xf32>, vector<8x32xf32>, vector<8x32xf32>, vector<8x32xf32>, vector<8x32xf32>, vector<8x32xf32> -> vector<64x32xf32>
    %437 = arith.truncf %436 : vector<64x32xf32> to vector<64x32xbf16>
    %c0_130 = arith.constant 0 : index
    %c0_131 = arith.constant 0 : index
    %438 = vector.load %arg8[%c0_130, %c0_131] : memref<32x128xbf16, #tpu.memory_space<vmem>>, vector<32x128xbf16>
    %cst_132 = arith.constant dense<0.000000e+00> : vector<64x128xf32>
    %439 = tpu.matmul %437, %438, %cst_132 {dimension_numbers = #tpu.dot_dimension_numbers<[1], [0], [0], [1], [0, 0, 1, 1], [], []>} : vector<64x32xbf16>, vector<32x128xbf16>, vector<64x128xf32> -> vector<64x128xf32>
    %c0_133 = arith.constant 0 : index
    %c0_134 = arith.constant 0 : index
    %440 = vector.load %arg9[%c0_133, %c0_134] : memref<1x128xf32, #tpu.memory_space<vmem>>, vector<1x128xf32>
    %441 = vector.broadcast %440 : vector<1x128xf32> to vector<64x128xf32>
    %442 = arith.addf %439, %441 : vector<64x128xf32>
    %c0_135 = arith.constant 0 : index
    %c0_136 = arith.constant 0 : index
    %443 = vector.load %arg10[%c0_135, %c0_136] : memref<64x128xf32, #tpu.memory_space<vmem>>, vector<64x128xf32>
    tpu.vector_store %arg10[%c0_135, %c0_136], %442 {strides = array<i32>} : memref<64x128xf32, #tpu.memory_space<vmem>>, vector<64x128xf32>,
    return
  }
  func.func @transform_0(%arg0: i32) -> (i32, i32) {
    %c0_i32 = arith.constant 0 : i32
    %c0_i32_0 = arith.constant 0 : i32
    %c0_i32_1 = arith.constant 0 : i32
    return %c0_i32, %c0_i32_0 : i32, i32
  }
  func.func @transform_1(%arg0: i32) -> (i32, i32) {
    %c0_i32 = arith.constant 0 : i32
    %c0_i32_0 = arith.constant 0 : i32
    %c0_i32_1 = arith.constant 0 : i32
    return %c0_i32, %c0_i32_0 : i32, i32
  }
  func.func @transform_2(%arg0: i32) -> (i32, i32) {
    %c0_i32 = arith.constant 0 : i32
    %c0_i32_0 = arith.constant 0 : i32
    %c0_i32_1 = arith.constant 0 : i32
    return %c0_i32, %c0_i32_0 : i32, i32
  }
  func.func @transform_3(%arg0: i32) -> (i32, i32) {
    %c0_i32 = arith.constant 0 : i32
    %c0_i32_0 = arith.constant 0 : i32
    %c0_i32_1 = arith.constant 0 : i32
    return %c0_i32, %c0_i32_0 : i32, i32
  }
  func.func @transform_4(%arg0: i32) -> (i32, i32) {
    %c0_i32 = arith.constant 0 : i32
    %c0_i32_0 = arith.constant 0 : i32
    %c0_i32_1 = arith.constant 0 : i32
    return %c0_i32, %c0_i32_0 : i32, i32
  }
  func.func @transform_5(%arg0: i32) -> (i32, i32) {
    %c0_i32 = arith.constant 0 : i32
    %c0_i32_0 = arith.constant 0 : i32
    %c0_i32_1 = arith.constant 0 : i32
    return %c0_i32, %c0_i32_0 : i32, i32
  }
  func.func @transform_6(%arg0: i32) -> (i32, i32) {
    %c0_i32 = arith.constant 0 : i32
    %c0_i32_0 = arith.constant 0 : i32
    %c0_i32_1 = arith.constant 0 : i32
    return %c0_i32, %c0_i32_0 : i32, i32
  }
  func.func @transform_7(%arg0: i32) -> (i32, i32) {
    %c0_i32 = arith.constant 0 : i32
    %c0_i32_0 = arith.constant 0 : i32
    %c0_i32_1 = arith.constant 0 : i32
    return %c0_i32, %c0_i32_0 : i32, i32
  }
  func.func @transform_8(%arg0: i32) -> (i32, i32) {
    %c0_i32 = arith.constant 0 : i32
    %c0_i32_0 = arith.constant 0 : i32
    %c0_i32_1 = arith.constant 0 : i32
    return %c0_i32, %c0_i32_0 : i32, i32
  }
  func.func @transform_9(%arg0: i32) -> (i32, i32) {
    %c0_i32 = arith.constant 0 : i32
    %c0_i32_0 = arith.constant 0 : i32
    %c0_i32_1 = arith.constant 0 : i32
    return %c0_i32, %c0_i32_0 : i32, i32
  }
}

</mosaic_0001>

<bundles_post_ra>
// kernel: tpu_custom_call.1
= control target key start
LH: loop header
LB: loop body
LE: loop exit
PB: predicated region body
PF: predicated region fallthrough
CT: control target
= control target key end

     0   :  { %vm65_vm0 = vcmask 130048   ;;  %v1875_v13 = vmov 0.0   ;;  %vm1876_vm1 = vmmov 0   ;;  %s2308_s0 = inlined_call_operand.vmem [shape: f32[64,16], index: 0, kind: input, shape index: {}]   ;;  %s2309_s1 = inlined_call_operand.vmem [shape: bf16[16,128], index: 1, kind: input, shape index: {}]   ;;  %s2310_s2 = inlined_call_operand.vmem [shape: bf16[32,128], index: 2, kind: input, shape index: {}]   ;;  %s2311_s3 = inlined_call_operand.vmem [shape: f32[1,128], index: 3, kind: input, shape index: {}]   ;;  %s2312_s4 = inlined_call_operand.vmem [shape: bf16[32,128], index: 4, kind: input, shape index: {}]   ;;  %s2313_s5 = inlined_call_operand.vmem [shape: bf16[32,128], index: 5, kind: input, shape index: {}]   ;;  %s2314_s6 = inlined_call_operand.vmem [shape: f32[1,128], index: 6, kind: input, shape index: {}]   ;;  %s2315_s7 = inlined_call_operand.vmem [shape: bf16[32,128], index: 7, kind: input, shape index: {}]   ;;  %s2316_s8 = inlined_call_operand.vmem [shape: f32[1,128], index: 8, kind: input, shape index: {}]   ;;  %s2317_s9 = inlined_call_operand.hbm [shape: f32[64,128], index: 9, kind: output, shape index: {}]  }
   0x1   :  { %v1780_v0 = vld [vmem:[%s2309_s1] sm:$0xff]   ;;  %v35_v2 = vld [vmem:[%s2308_s0 + $0x8] sm:$0xff]  ;;  %v36_v6 = vld [vmem:[%s2308_s0 + $0x10] sm:$0xff] }
   0x2   :  { %v34_v1 = vld [vmem:[%s2308_s0] sm:$0xff]  ;;  %1608 = vmatprep.subr.bf16.mxu0 %v1780_v0  ;;  %1770 = vmatprep.subr.bf16.mxu1 %v1780_v0  ;;  %v39_v5 = vld [vmem:[%s2308_s0 + $0x28] sm:$0xff]  ;;  %v37_v7 = vld [vmem:[%s2308_s0 + $0x18] sm:$0xff] }
   0x3   :  { %v38_v3 = vld [vmem:[%s2308_s0 + $0x20] sm:$0xff]  ;;  %v49_v4 = vpack.c.bf16 %v35_v2, %v34_v1  ;;  %1609 = vmatpush3.bf16.msra.mxu0 %v1780_v0  ;;  %1771 = vmatpush3.bf16.msra.mxu1 %v1780_v0  ;;  %v50_v9 = vpack.c.bf16 %v37_v7, %v36_v6  ;;  %v40_v10 = vld [vmem:[%s2308_s0 + $0x30] sm:$0xff]  ;;  %v41_v11 = vld [vmem:[%s2308_s0 + $0x38] sm:$0xff] }
   0x4   :  { %v51_v8 = vpack.c.bf16 %v39_v5, %v38_v3  ;;  %v52_v12 = vpack.c.bf16 %v41_v11, %v40_v10  ;;  %1618 = vmatprep.subr.bf16.mxu1 %v1875_v13  ;;  %v1965_v14 = vld [vmem:[%s2310_s2 + $0x8] sm:$0xff]   ;;  %v1971_v15 = vld [vmem:[%s2310_s2] sm:$0xff]   ;;  %1634 = vmatprep.subr.bf16.mxu0 %v1875_v13 }
   0x5   :  { %1610 = vmatprep.mubr.msk.bf16.mxu0 %vm65_vm0, %v49_v4 }
   0x6   :  { %1614 = vmatprep.mubr.msk.bf16.mxu1 %vm65_vm0, %v51_v8  ;;  %1611 = vmatmul.mubr.msk.bf16.vlgmr.msra.gmra.mxu0 %vm65_vm0, %v50_v9 }
   0x7   :  { %1615 = vmatmul.mubr.msk.bf16.vlgmr.msra.gmra.mxu1 %vm65_vm0, %v52_v12  ;;  %1635 = vmatpush3.bf16.msra.mxu0 %v1965_v14 }
   0x8   :  { %1619 = vmatpush3.bf16.msra.mxu1 %v1965_v14  ;;  %1622 = vmatprep.mubr.msk.bf16.mxu1 %vm1876_vm1, %v1875_v13 }
   0x9   :  { %1620 = vmatprep.subr.bf16.mxu1 %v1875_v13  ;;  %1636 = vmatprep.subr.bf16.mxu0 %v1875_v13 }
   0xa   :  { %1638 = vmatprep.mubr.msk.bf16.mxu0 %vm1876_vm1, %v1875_v13 }
   0xb   :  { %14 = vsyncpa [#allocation3], 0  ;;  %1637 = vmatpush3.bf16.msra.mxu0 %v1971_v15  ;;  %v1877_v16 = vmov 0   ;;  %v1505_v17 = vld [vmem:[%s2311_s3] ss:$0 sm:$0xff]  ;;  %s1878_s3 = smov 64  }
   0xc   :  { %1621 = vmatpush3.bf16.msra.mxu1 %v1971_v15  ;;  %1650 = vmatprep.subr.bf16.mxu0 %v1875_v13  ;;  %s1879_s30 = smov 32   ;;  %vm155_vm2 = vcmask 261120   ;;  %s1880_s21 = smov [#allocation2]  }
   0xd   :  { %1626 = vmatprep.subr.bf16.mxu1 %v1875_v13  ;;  %s1494_s22 = sshll.u32 %s1880_s21, 4  ;;  %s1495_s22 = int_to_ptr.vmem [resolvable:$true] %s1494_s22 }
   0xe   :  { %p1858_p1 = scmp.lt.s32.totalorder %s1495_s22, %s1495_s22 }
   0xf   :  { %1623 = vmatmul.mubr.bf16.vlgmr.msra.gmra.mxu1 %v1877_v16 }
  0x10   :  { %1627 = vmatpush3.bf16.msra.mxu1 %v1965_v14  ;;  %1630 = vmatprep.mubr.msk.bf16.mxu1 %vm1876_vm1, %v1875_v13 }
  0x11   :  { %1628 = vmatprep.subr.bf16.mxu1 %v1875_v13 }
  0x14   :  { %1629 = vmatpush3.bf16.msra.mxu1 %v1971_v15 }
  0x15   :  { %1642 = vmatprep.subr.bf16.mxu1 %v1875_v13 }
  0xc6   :  { %v1612_v18 = vpop.f32.mrf.mxu0 }
  0xc7   :  { %v1616_v19 = vpop.f32.mrf.mxu1  ;;  %v1998_v20 = vadd.f32 %v1612_v18, %v1505_v17 }
  0xc8   :  { %v2000_v21 = vadd.f32 %v1616_v19, %v1505_v17  ;;  %v112_v22 = vpop.f32.mrf.mxu0 }
  0xc9   :  { %v128_v23 = vpop.f32.mrf.mxu1  ;;  %v113_v30 = vadd.f32 %v1505_v17, %v112_v22 }
  0xca   :  { %v2002_v24 = vadd.f32 %v1505_v17, %v128_v23  ;;  %v1613_v25 = vpop.f32.mrf.mxu0 }
  0xcb   :  { %v1617_v26 = vpop.f32.mrf.mxu1  ;;  %v2004_v27 = vadd.f32 %v1613_v25, %v1505_v17 }
  0xcc   :  { %v2006_v28 = vadd.f32 %v1617_v26, %v1505_v17  ;;  %v115_v50 = vpop.f32.mrf.mxu0 }
  0xcd   :  { %v131_v29 = vpop.f32.mrf.mxu1  ;;  %v116_v51 = vadd.f32 %v1505_v17, %v115_v50 }
  0xce   :  { %v2008_v31 = vadd.f32 %v1505_v17, %v131_v29 }
  0xcf   :  { %v193_v32 = vpop.f32.mrf.mxu1 }
  0xd0   :  { %v199_v33 = vadd.f32 %v193_v32, %v113_v30 }
  0xd1   :  { %v1624_v34 = vpop.f32.mrf.mxu1 }
  0xd2   :  { %1789 = vtanh.f32 %v199_v33 }
  0xd3   :  { %v196_v35 = vpop.f32.mrf.mxu1 }
  0xd5   :  { %v1625_v36 = vpop.f32.mrf.mxu1 }
  0xdf   :  { %v1790_v37 = vpop.eup %1789 }
  0xe0   :  { %205 = vrot.lane.b32.xlu0 %v1790_v37, %s1878_s3  ;;  %v201_v38 = vmul.f32 0.5, %v1790_v37 }
  0xe2   :  { %v202_v39 = vadd.f32 0.5, %v201_v38 }
  0xe4   :  { %v203_v42 = vmul.f32 0.0, %v202_v39 }
 0x152   :  { %v206_v40 = vpop.permute.xlu0 %205 }
 0x153   :  { %v208_v41 = vmul.f32 %v206_v40, %v202_v39 }
 0x155   :  { %210 = vrot.lane.b32.xlu0 %v208_v41, %s1879_s30 }
 0x1c7   :  { %v211_v43 = vpop.permute.xlu0 %210 }
 0x1c8   :  { %v213_v44 = vadd.f32 %v211_v43, %v203_v42 }
 0x1ca   :  { %1791 = vtanh.f32 %v213_v44 }
 0x1d7   :  { %v1792_v45 = vpop.eup %1791 }
 0x1d8   :  { %216 = vrot.lane.b32.xlu1 %v1792_v45, %s1878_s3 }
 0x24a   :  { %v217_v46 = vpop.permute.xlu1 %216 }
 0x24b   :  { %v2013_v47 = vmul.f32 %v217_v46, %v202_v39 }
 0x24d   :  { %v220_v48 = vpack.c.bf16 %v2013_v47, %v2013_v47 }
 0x24f   :  { %222 = vrot.lane.b32.xlu1 %v220_v48, %s1879_s30 }
 0x2c1   :  { %v223_v49 = vpop.permute.xlu1 %222 }
 0x2c2   :  { %1631 = vmatmul.mubr.msk.bf16.vlgmr.msra.gmra.mxu1 %vm155_vm2, %v223_v49 }
 0x2c3   :  { %1643 = vmatpush3.bf16.msra.mxu1 %v1965_v14  ;;  %1646 = vmatprep.mubr.msk.bf16.mxu1 %vm1876_vm1, %v1875_v13 }
 0x2c4   :  { %1644 = vmatprep.subr.bf16.mxu1 %v1875_v13 }
 0x2c7   :  { %1645 = vmatpush3.bf16.msra.mxu1 %v1971_v15 }
 0x2c8   :  { %1658 = vmatprep.subr.bf16.mxu1 %v1875_v13 }
 0x382   :  { %v261_v52 = vpop.f32.mrf.mxu1 }
 0x383   :  { %v267_v53 = vadd.f32 %v261_v52, %v116_v51 }
 0x384   :  { %v1632_v54 = vpop.f32.mrf.mxu1 }
 0x385   :  { %1793 = vtanh.f32 %v267_v53 }
 0x386   :  { %v264_v55 = vpop.f32.mrf.mxu1 }
 0x388   :  { %v1633_v56 = vpop.f32.mrf.mxu1 }
 0x392   :  { %v1794_v57 = vpop.eup %1793 }
 0x393   :  { %273 = vrot.lane.b32.xlu0 %v1794_v57, %s1878_s3  ;;  %v269_v58 = vmul.f32 0.5, %v1794_v57 }
 0x395   :  { %v270_v59 = vadd.f32 0.5, %v269_v58 }
 0x397   :  { %v271_v62 = vmul.f32 %v270_v59, %v213_v44 }
 0x405   :  { %v274_v60 = vpop.permute.xlu0 %273 }
 0x406   :  { %v276_v61 = vmul.f32 %v274_v60, %v270_v59 }
 0x408   :  { %278 = vrot.lane.b32.xlu1 %v276_v61, %s1879_s30 }
 0x47a   :  { %v279_v63 = vpop.permute.xlu1 %278 }
 0x47b   :  { %v281_v0 = vadd.f32 %v279_v63, %v271_v62 }
 0x47d   :  { %1795 = vtanh.f32 %v281_v0 }
 0x48a   :  { %v1796_v1 = vpop.eup %1795 }
 0x48b   :  { %284 = vrot.lane.b32.xlu0 %v1796_v1, %s1878_s3 }
 0x4fd   :  { %v285_v2 = vpop.permute.xlu0 %284 }
 0x4fe   :  { %v2028_v3 = vmul.f32 %v285_v2, %v270_v59 }
 0x500   :  { %v288_v4 = vpack.c.bf16 %v2028_v3, %v2028_v3 }
 0x502   :  { %290 = vrot.lane.b32.xlu1 %v288_v4, %s1879_s30 }
 0x574   :  { %v291_v5 = vpop.permute.xlu1 %290 }
 0x575   :  { %1639 = vmatmul.mubr.msk.bf16.vlgmr.msra.gmra.mxu0 %vm155_vm2, %v291_v5 }
 0x576   :  { %1651 = vmatpush3.bf16.msra.mxu0 %v1965_v14  ;;  %1654 = vmatprep.mubr.msk.bf16.mxu0 %vm1876_vm1, %v1875_v13 }
 0x577   :  { %1652 = vmatprep.subr.bf16.mxu0 %v1875_v13 }
 0x57a   :  { %1653 = vmatpush3.bf16.msra.mxu0 %v1971_v15 }
 0x57b   :  { %1666 = vmatprep.subr.bf16.mxu0 %v1875_v13 }
 0x635   :  { %v329_v6 = vpop.f32.mrf.mxu0 }
 0x636   :  { %v335_v7 = vadd.f32 %v329_v6, %v1998_v20 }
 0x637   :  { %v1640_v8 = vpop.f32.mrf.mxu0 }
 0x638   :  { %1797 = vtanh.f32 %v335_v7 }
 0x639   :  { %v332_v9 = vpop.f32.mrf.mxu0 }
 0x63b   :  { %v1641_v10 = vpop.f32.mrf.mxu0 }
 0x645   :  { %v1798_v11 = vpop.eup %1797 }
 0x646   :  { %341 = vrot.lane.b32.xlu0 %v1798_v11, %s1878_s3  ;;  %v337_v12 = vmul.f32 0.5, %v1798_v11 }
 0x648   :  { %v338_v17 = vadd.f32 0.5, %v337_v12 }
 0x64a   :  { %v339_v22 = vmul.f32 %v338_v17, %v281_v0 }
 0x6b8   :  { %v342_v18 = vpop.permute.xlu0 %341 }
 0x6b9   :  { %v344_v19 = vmul.f32 %v342_v18, %v338_v17 }
 0x6bb   :  { %346 = vrot.lane.b32.xlu1 %v344_v19, %s1879_s30 }
 0x72d   :  { %v347_v23 = vpop.permute.xlu1 %346 }
 0x72e   :  { %v349_v25 = vadd.f32 %v347_v23, %v339_v22 }
 0x730   :  { %1799 = vtanh.f32 %v349_v25 }
 0x73d   :  { %v1800_v26 = vpop.eup %1799 }
 0x73e   :  { %352 = vrot.lane.b32.xlu0 %v1800_v26, %s1878_s3 }
 0x7b0   :  { %v353_v20 = vpop.permute.xlu0 %352 }
 0x7b1   :  { %v2044_v29 = vmul.f32 %v353_v20, %v338_v17 }
 0x7b3   :  { %v356_v30 = vpack.c.bf16 %v2044_v29, %v2044_v29 }
 0x7b5   :  { %358 = vrot.lane.b32.xlu1 %v356_v30, %s1879_s30 }
 0x827   :  { %v359_v32 = vpop.permute.xlu1 %358 }
 0x828   :  { %1647 = vmatmul.mubr.msk.bf16.vlgmr.msra.gmra.mxu1 %vm155_vm2, %v359_v32 }
 0x829   :  { %1659 = vmatpush3.bf16.msra.mxu1 %v1965_v14  ;;  %1662 = vmatprep.mubr.msk.bf16.mxu1 %vm1876_vm1, %v1875_v13 }
 0x82a   :  { %1660 = vmatprep.subr.bf16.mxu1 %v1875_v13 }
 0x82d   :  { %1661 = vmatpush3.bf16.msra.mxu1 %v1971_v15 }
 0x82e   :  { %1674 = vmatprep.subr.bf16.mxu1 %v1875_v13 }
 0x8e8   :  { %v397_v33 = vpop.f32.mrf.mxu1 }
 0x8e9   :  { %v403_v34 = vadd.f32 %v397_v33, %v2004_v27 }
 0x8ea   :  { %v1648_v35 = vpop.f32.mrf.mxu1 }
 0x8eb   :  { %1801 = vtanh.f32 %v403_v34 }
 0x8ec   :  { %v400_v36 = vpop.f32.mrf.mxu1 }
 0x8ee   :  { %v1649_v37 = vpop.f32.mrf.mxu1 }
 0x8f8   :  { %v1802_v38 = vpop.eup %1801 }
 0x8f9   :  { %409 = vrot.lane.b32.xlu0 %v1802_v38, %s1878_s3  ;;  %v405_v39 = vmul.f32 0.5, %v1802_v38 }
 0x8fb   :  { %v406_v40 = vadd.f32 0.5, %v405_v39 }
 0x8fd   :  { %v407_v43 = vmul.f32 %v406_v40, %v349_v25 }
 0x96b   :  { %v410_v41 = vpop.permute.xlu0 %409 }
 0x96c   :  { %v412_v42 = vmul.f32 %v410_v41, %v406_v40 }
 0x96e   :  { %414 = vrot.lane.b32.xlu1 %v412_v42, %s1879_s30 }
 0x9e0   :  { %v415_v44 = vpop.permute.xlu1 %414 }
 0x9e1   :  { %v417_v45 = vadd.f32 %v415_v44, %v407_v43  ;;  %v705_v44 = vpack.c.bf16 %v2028_v3, %v2013_v47  ;;  %v2126_v3 = vld [vmem:[%s2313_s5 + $0x8] sm:$0xff]  }
 0x9e3   :  { %1803 = vtanh.f32 %v417_v45 }
 0x9f0   :  { %v1804_v46 = vpop.eup %1803 }
 0x9f1   :  { %420 = vrot.lane.b32.xlu0 %v1804_v46, %s1878_s3 }
 0xa63   :  { %v421_v27 = vpop.permute.xlu0 %420 }
 0xa64   :  { %v2060_v48 = vmul.f32 %v421_v27, %v406_v40 }
 0xa66   :  { %v424_v49 = vpack.c.bf16 %v2060_v48, %v2060_v48  ;;  %v706_v47 = vpack.c.bf16 %v2060_v48, %v2044_v29 }
 0xa68   :  { %426 = vrot.lane.b32.xlu1 %v424_v49, %s1879_s30 }
 0xada   :  { %v427_v50 = vpop.permute.xlu1 %426 }
 0xadb   :  { %1655 = vmatmul.mubr.msk.bf16.vlgmr.msra.gmra.mxu0 %vm155_vm2, %v427_v50 }
 0xadc   :  { %1667 = vmatpush3.bf16.msra.mxu0 %v1965_v14  ;;  %1670 = vmatprep.mubr.msk.bf16.mxu0 %vm1876_vm1, %v1875_v13 }
 0xadd   :  { %1668 = vmatprep.subr.bf16.mxu0 %v1875_v13 }
 0xae0   :  { %1669 = vmatpush3.bf16.msra.mxu0 %v1971_v15 }
 0xb9b   :  { %v465_v51 = vpop.f32.mrf.mxu0 }
 0xb9c   :  { %v471_v52 = vadd.f32 %v465_v51, %v2002_v24 }
 0xb9d   :  { %v1656_v53 = vpop.f32.mrf.mxu0 }
 0xb9e   :  { %1805 = vtanh.f32 %v471_v52  ;;  %v2133_v52 = vld [vmem:[%s2313_s5] sm:$0xff]  }
 0xb9f   :  { %v468_v54 = vpop.f32.mrf.mxu0 }
 0xba1   :  { %v1657_v55 = vpop.f32.mrf.mxu0 }
 0xbab   :  { %v1806_v56 = vpop.eup %1805 }
 0xbac   :  { %477 = vrot.lane.b32.xlu0 %v1806_v56, %s1878_s3  ;;  %v473_v57 = vmul.f32 0.5, %v1806_v56  ;;  %v2158_v56 = vld [vmem:[%s2314_s6] ss:$0 sm:$0xff] }
 0xbae   :  { %v474_v58 = vadd.f32 0.5, %v473_v57 }
 0xbb0   :  { %v475_v61 = vmul.f32 %v474_v58, %v417_v45  ;;  %v1784_v45 = vld [vmem:[%s2312_s4] sm:$0xff]  }
 0xc1e   :  { %v478_v59 = vpop.permute.xlu0 %477 }
 0xc1f   :  { %v480_v60 = vmul.f32 %v478_v59, %v474_v58 }
 0xc21   :  { %482 = vrot.lane.b32.xlu1 %v480_v60, %s1879_s30 }
 0xc93   :  { %v483_v62 = vpop.permute.xlu1 %482 }
 0xc94   :  { %v485_v63 = vadd.f32 %v483_v62, %v475_v61 }
 0xc96   :  { %1807 = vtanh.f32 %v485_v63 }
 0xca3   :  { %v1808_v0 = vpop.eup %1807 }
 0xca4   :  { %488 = vrot.lane.b32.xlu0 %v1808_v0, %s1878_s3 }
 0xd16   :  { %v489_v24 = vpop.permute.xlu0 %488 }
 0xd17   :  { %v2075_v1 = vmul.f32 %v489_v24, %v474_v58 }
 0xd19   :  { %v492_v2 = vpack.c.bf16 %v2075_v1, %v2075_v1 }
 0xd1b   :  { %494 = vrot.lane.b32.xlu1 %v492_v2, %s1879_s30 }
 0xd8d   :  { %v495_v4 = vpop.permute.xlu1 %494 }
 0xd8e   :  { %1663 = vmatmul.mubr.msk.bf16.vlgmr.msra.gmra.mxu1 %vm155_vm2, %v495_v4 }
 0xd8f   :  { %1675 = vmatpush3.bf16.msra.mxu1 %v1965_v14  ;;  %1678 = vmatprep.mubr.msk.bf16.mxu1 %vm1876_vm1, %v1875_v13 }
 0xd90   :  { %1676 = vmatprep.subr.bf16.mxu1 %v1875_v13 }
 0xd93   :  { %1677 = vmatpush3.bf16.msra.mxu1 %v1971_v15 }
 0xd94   :  { %1694 = vmatprep.subr.bf16.mxu1 %v1875_v13 }
 0xe4e   :  { %v533_v5 = vpop.f32.mrf.mxu1 }
 0xe4f   :  { %v539_v6 = vadd.f32 %v533_v5, %v2008_v31 }
 0xe50   :  { %v1664_v7 = vpop.f32.mrf.mxu1 }
 0xe51   :  { %1809 = vtanh.f32 %v539_v6 }
 0xe52   :  { %v536_v8 = vpop.f32.mrf.mxu1 }
 0xe54   :  { %v1665_v9 = vpop.f32.mrf.mxu1 }
 0xe5e   :  { %v1810_v10 = vpop.eup %1809 }
 0xe5f   :  { %545 = vrot.lane.b32.xlu0 %v1810_v10, %s1878_s3  ;;  %v541_v14 = vmul.f32 0.5, %v1810_v10 }
 0xe61   :  { %v542_v11 = vadd.f32 0.5, %v541_v14 }
 0xe63   :  { %v543_v18 = vmul.f32 %v542_v11, %v485_v63 }
 0xed1   :  { %v546_v12 = vpop.permute.xlu0 %545 }
 0xed2   :  { %v548_v17 = vmul.f32 %v546_v12, %v542_v11 }
 0xed4   :  { %550 = vrot.lane.b32.xlu1 %v548_v17, %s1879_s30 }
 0xf46   :  { %v551_v15 = vpop.permute.xlu1 %550 }
 0xf47   :  { %v553_v19 = vadd.f32 %v551_v15, %v543_v18 }
 0xf49   :  { %1811 = vtanh.f32 %v553_v19 }
 0xf56   :  { %v1812_v22 = vpop.eup %1811 }
 0xf57   :  { %556 = vrot.lane.b32.xlu0 %v1812_v22, %s1878_s3 }
 0xfc9   :  { %v557_v31 = vpop.permute.xlu0 %556 }
 0xfca   :  { %v2091_v23 = vmul.f32 %v557_v31, %v542_v11 }
 0xfcc   :  { %v560_v25 = vpack.c.bf16 %v2091_v23, %v2091_v23 }
 0xfce   :  { %562 = vrot.lane.b32.xlu1 %v560_v25, %s1879_s30 }
0x1040   :  { %v563_v26 = vpop.permute.xlu1 %562 }
0x1041   :  { %1671 = vmatmul.mubr.msk.bf16.vlgmr.msra.gmra.mxu0 %vm155_vm2, %v563_v26 }
0x1101   :  { %v601_v20 = vpop.f32.mrf.mxu0 }
0x1102   :  { %v607_v30 = vadd.f32 %v601_v20, %v2000_v21  ;;  %v1783_v21 = vld [vmem:[%s2312_s4 + $0x8] sm:$0xff]  }
0x1103   :  { %v1672_v32 = vpop.f32.mrf.mxu0  ;;  %1682 = vmatprep.subr.bf16.mxu0 %v1783_v21 }
0x1104   :  { %1813 = vtanh.f32 %v607_v30  ;;  %1683 = vmatpush3.bf16.msra.mxu0 %v1783_v21  ;;  %v707_v30 = vpack.c.bf16 %v2091_v23, %v2075_v1 }
0x1105   :  { %v604_v33 = vpop.f32.mrf.mxu0  ;;  %1684 = vmatprep.subr.bf16.mxu0 %v1784_v45 }
0x1107   :  { %v1673_v34 = vpop.f32.mrf.mxu0 }
0x1108   :  { %1685 = vmatpush3.bf16.msra.mxu0 %v1784_v45 }
0x1109   :  { %1710 = vmatprep.subr.bf16.mxu0 %v1875_v13 }
0x1111   :  { %v1814_v35 = vpop.eup %1813 }
0x1112   :  { %613 = vrot.lane.b32.xlu0 %v1814_v35, %s1878_s3  ;;  %v609_v36 = vmul.f32 0.5, %v1814_v35 }
0x1114   :  { %v610_v37 = vadd.f32 0.5, %v609_v36 }
0x1116   :  { %v611_v40 = vmul.f32 %v610_v37, %v553_v19 }
0x1184   :  { %v614_v38 = vpop.permute.xlu0 %613 }
0x1185   :  { %v616_v39 = vmul.f32 %v614_v38, %v610_v37 }
0x1187   :  { %618 = vrot.lane.b32.xlu1 %v616_v39, %s1879_s30 }
0x11f9   :  { %v619_v41 = vpop.permute.xlu1 %618 }
0x11fa   :  { %v2100_v42 = vadd.f32 %v619_v41, %v611_v40 }
0x11fc   :  { %1815 = vtanh.f32 %v2100_v42 }
0x1209   :  { %v1816_v43 = vpop.eup %1815 }
0x120a   :  { %624 = vrot.lane.b32.xlu0 %v1816_v43, %s1878_s3 }
0x120e   :  { %719 = vrot.lane.b32.xlu0 %v705_v44, %s1879_s30 }
0x127c   :  { %v625_v46 = vpop.permute.xlu0 %624 }
0x127d   :  { %v2114_v27 = vmul.f32 %v625_v46, %v610_v37 }
0x127f   :  { %v628_v49 = vpack.c.bf16 %v2114_v27, %v2114_v27 }
0x1280   :  { %v720_v50 = vpop.permute.xlu0 %719 }
0x1281   :  { %630 = vrot.lane.b32.xlu1 %v628_v49, %s1879_s30  ;;  %1686 = vmatprep.mubr.msk.bf16.mxu0 %vm155_vm2, %v720_v50 }
0x1285   :  { %721 = vrot.lane.b32.xlu1 %v706_v47, %s1879_s30 }
0x12f3   :  { %v631_v51 = vpop.permute.xlu1 %630 }
0x12f4   :  { %1679 = vmatmul.mubr.msk.bf16.vlgmr.msra.gmra.mxu1 %vm155_vm2, %v631_v51 }
0x12f5   :  { %1695 = vmatpush3.bf16.msra.mxu1 %v2126_v3  ;;  %1698 = vmatprep.mubr.msk.bf16.mxu1 %vm1876_vm1, %v1875_v13 }
0x12f6   :  { %1696 = vmatprep.subr.bf16.mxu1 %v1875_v13 }
0x12f7   :  { %v722_v29 = vpop.permute.xlu1 %721 }
0x12f8   :  { %1687 = vmatmul.mubr.msk.bf16.vlgmr.msra.gmra.mxu0 %vm155_vm2, %v722_v29 }
0x12f9   :  { %1697 = vmatpush3.bf16.msra.mxu1 %v2133_v52  ;;  %1711 = vmatpush3.bf16.msra.mxu0 %v2126_v3 }
0x12fa   :  { %1702 = vmatprep.subr.bf16.mxu1 %v1875_v13  ;;  %1712 = vmatprep.subr.bf16.mxu0 %v1875_v13 }
0x12fc   :  { %1699 = vmatmul.mubr.bf16.vlgmr.msra.gmra.mxu1 %v1877_v16 }
0x12fd   :  { %1703 = vmatpush3.bf16.msra.mxu1 %v2126_v3  ;;  %1706 = vmatprep.mubr.msk.bf16.mxu1 %vm1876_vm1, %v1875_v13 }
0x12fe   :  { %1704 = vmatprep.subr.bf16.mxu1 %v1875_v13  ;;  %1713 = vmatpush3.bf16.msra.mxu0 %v2133_v52 }
0x12ff   :  { %1726 = vmatprep.subr.bf16.mxu0 %v1875_v13 }
0x1301   :  { %1705 = vmatpush3.bf16.msra.mxu1 %v2133_v52 }
0x1302   :  { %1718 = vmatprep.subr.bf16.mxu1 %v1875_v13 }
0x13b4   :  { %v669_v48 = vpop.f32.mrf.mxu1 }
0x13b5   :  { %v675_v53 = vadd.f32 %v669_v48, %v2006_v28 }
0x13b6   :  { %v1680_v54 = vpop.f32.mrf.mxu1 }
0x13b8   :  { %v672_v16 = vpop.f32.mrf.mxu1  ;;  %v2153_v55 = vpop.f32.mrf.mxu0 }
0x13ba   :  { %v1681_v57 = vpop.f32.mrf.mxu1  ;;  %v785_v58 = vpop.f32.mrf.mxu0 }
0x13bb   :  { %v786_v59 = vadd.f32 %v2158_v56, %v785_v58 }
0x13bc   :  { %v862_v60 = vpop.f32.mrf.mxu1  ;;  %v2184_v34 = vpop.f32.mrf.mxu0 }
0x13bd   :  { %v868_v61 = vadd.f32 %v862_v60, %v786_v59  ;;  %v794_v59 = vadd.f32 %v2153_v55, %v2158_v56 }
0x13be   :  { %v1700_v62 = vpop.f32.mrf.mxu1  ;;  %v788_v35 = vpop.f32.mrf.mxu0 }
0x13bf   :  { %1817 = vtanh.f32 %v868_v61  ;;  %v789_v36 = vadd.f32 %v2158_v56, %v788_v35 }
0x13c0   :  { %v865_v63 = vpop.f32.mrf.mxu1 }
0x13c2   :  { %v1701_v0 = vpop.f32.mrf.mxu1 }
0x13cc   :  { %v1818_v28 = vpop.eup %1817 }
0x13cd   :  { %874 = vrot.lane.b32.xlu0 %v1818_v28, %s1878_s3  ;;  %v870_v24 = vmul.f32 0.5, %v1818_v28 }
0x13cf   :  { %v871_v2 = vadd.f32 0.5, %v870_v24 }
0x13d1   :  { %v872_v6 = vmul.f32 0.0, %v871_v2 }
0x143f   :  { %v875_v4 = vpop.permute.xlu0 %874 }
0x1440   :  { %v877_v5 = vmul.f32 %v875_v4, %v871_v2 }
0x1442   :  { %879 = vrot.lane.b32.xlu1 %v877_v5, %s1879_s30 }
0x14b4   :  { %v880_v7 = vpop.permute.xlu1 %879 }
0x14b5   :  { %v882_v8 = vadd.f32 %v880_v7, %v872_v6 }
0x14b7   :  { %1819 = vtanh.f32 %v882_v8 }
0x14b8   :  { %1821 = vtanh.f32 %v675_v53 }
0x14c4   :  { %v1820_v9 = vpop.eup %1819 }
0x14c5   :  { %885 = vrot.lane.b32.xlu0 %v1820_v9, %s1878_s3  ;;  %v1822_v10 = vpop.eup %1821 }
0x14c6   :  { %v677_v14 = vmul.f32 0.5, %v1822_v10 }
0x14c8   :  { %v678_v18 = vadd.f32 0.5, %v677_v14 }
0x14c9   :  { %681 = vrot.lane.b32.xlu0 %v1822_v10, %s1878_s3 }
0x14ca   :  { %v679_v31 = vmul.f32 %v678_v18, %v2100_v42 }
0x1537   :  { %v886_v11 = vpop.permute.xlu0 %885 }
0x1538   :  { %v2165_v12 = vmul.f32 %v886_v11, %v871_v2 }
0x153a   :  { %v889_v17 = vpack.c.bf16 %v2165_v12, %v2165_v12 }
0x153b   :  { %v682_v15 = vpop.permute.xlu0 %681 }
0x153c   :  { %v684_v19 = vmul.f32 %v682_v15, %v678_v18  ;;  %891 = vrot.lane.b32.xlu1 %v889_v17, %s1879_s30  ;;  %v797_v17 = vadd.f32 %v2184_v34, %v2158_v56 }
0x153e   :  { %686 = vrot.lane.b32.xlu0 %v684_v19, %s1879_s30 }
0x15ae   :  { %v892_v22 = vpop.permute.xlu1 %891 }
0x15af   :  { %1707 = vmatmul.mubr.msk.bf16.vlgmr.msra.gmra.mxu1 %vm155_vm2, %v892_v22 }
0x15b0   :  { %v687_v25 = vpop.permute.xlu0 %686  ;;  %1719 = vmatpush3.bf16.msra.mxu1 %v2126_v3  ;;  %1722 = vmatprep.mubr.msk.bf16.mxu1 %vm1876_vm1, %v1875_v13 }
0x15b1   :  { %v689_v26 = vadd.f32 %v687_v25, %v679_v31  ;;  %1720 = vmatprep.subr.bf16.mxu1 %v1875_v13 }
0x15b3   :  { %1823 = vtanh.f32 %v689_v26 }
0x15b4   :  { %1721 = vmatpush3.bf16.msra.mxu1 %v2133_v52 }
0x15b5   :  { %1734 = vmatprep.subr.bf16.mxu1 %v1875_v13 }
0x15c0   :  { %v1824_v20 = vpop.eup %1823 }
0x15c1   :  { %692 = vrot.lane.b32.xlu0 %v1824_v20, %s1878_s3 }
0x15c5   :  { %723 = vrot.lane.b32.xlu0 %v707_v30, %s1879_s30 }
0x1633   :  { %v693_v32 = vpop.permute.xlu0 %692 }
0x1634   :  { %v695_v49 = vmul.f32 %v693_v32, %v678_v18 }
0x1636   :  { %v708_v47 = vpack.c.bf16 %v695_v49, %v2114_v27 }
0x1637   :  { %v724_v33 = vpop.permute.xlu0 %723 }
0x1638   :  { %1690 = vmatprep.mubr.msk.bf16.mxu0 %vm155_vm2, %v724_v33 }
0x166f   :  { %v930_v37 = vpop.f32.mrf.mxu1 }
0x1670   :  { %v936_v38 = vadd.f32 %v930_v37, %v789_v36 }
0x1671   :  { %v1708_v39 = vpop.f32.mrf.mxu1 }
0x1672   :  { %1825 = vtanh.f32 %v936_v38 }
0x1673   :  { %v933_v40 = vpop.f32.mrf.mxu1 }
0x1675   :  { %v1709_v41 = vpop.f32.mrf.mxu1 }
0x167f   :  { %v1826_v42 = vpop.eup %1825 }
0x1680   :  { %942 = vrot.lane.b32.xlu1 %v1826_v42, %s1878_s3  ;;  %v938_v1 = vmul.f32 0.5, %v1826_v42 }
0x1682   :  { %v939_v23 = vadd.f32 0.5, %v938_v1 }
0x1684   :  { %v940_v44 = vmul.f32 %v939_v23, %v882_v8 }
0x16f2   :  { %v943_v21 = vpop.permute.xlu1 %942 }
0x16f3   :  { %v945_v43 = vmul.f32 %v943_v21, %v939_v23 }
0x16f5   :  { %947 = vrot.lane.b32.xlu1 %v945_v43, %s1879_s30 }
0x1767   :  { %v948_v45 = vpop.permute.xlu1 %947 }
0x1768   :  { %v950_v46 = vadd.f32 %v948_v45, %v940_v44 }
0x176a   :  { %1827 = vtanh.f32 %v950_v46 }
0x1777   :  { %v1828_v50 = vpop.eup %1827 }
0x1778   :  { %953 = vrot.lane.b32.xlu1 %v1828_v50, %s1878_s3 }
0x177c   :  { %725 = vrot.lane.b32.xlu1 %v708_v47, %s1879_s30 }
0x17ea   :  { %v954_v51 = vpop.permute.xlu1 %953 }
0x17eb   :  { %v2192_v29 = vmul.f32 %v954_v51, %v939_v23 }
0x17ed   :  { %v957_v48 = vpack.c.bf16 %v2192_v29, %v2192_v29 }
0x17ee   :  { %v726_v53 = vpop.permute.xlu1 %725 }
0x17ef   :  { %959 = vrot.lane.b32.xlu0 %v957_v48, %s1879_s30  ;;  %1691 = vmatmul.mubr.msk.bf16.gmra.mxu0 %vm155_vm2, %v726_v53 }
0x17f0   :  { %1714 = vmatprep.mubr.msk.bf16.mxu0 %vm1876_vm1, %v1875_v13 }
0x1861   :  { %v960_v54 = vpop.permute.xlu0 %959 }
0x1862   :  { %1715 = vmatmul.mubr.msk.bf16.vlgmr.msra.gmra.mxu0 %vm155_vm2, %v960_v54 }
0x1863   :  { %1727 = vmatpush3.bf16.msra.mxu0 %v2126_v3  ;;  %1730 = vmatprep.mubr.msk.bf16.mxu0 %vm1876_vm1, %v1875_v13 }
0x1864   :  { %1728 = vmatprep.subr.bf16.mxu0 %v1875_v13 }
0x1867   :  { %1729 = vmatpush3.bf16.msra.mxu0 %v2133_v52 }
0x1868   :  { %1742 = vmatprep.subr.bf16.mxu0 %v1875_v13 }
0x18af   :  { %v2207_v27 = vpop.f32.mrf.mxu0 }
0x18b1   :  { %v2209_v16 = vpop.f32.mrf.mxu0 }
0x18b2   :  { %v802_v41 = vadd.f32 %v2158_v56, %v2209_v16 }
0x18b3   :  { %v2211_v57 = vpop.f32.mrf.mxu0 }
0x18b5   :  { %v2213_v58 = vpop.f32.mrf.mxu0 }
0x1922   :  { %v998_v60 = vpop.f32.mrf.mxu0 }
0x1923   :  { %v1004_v61 = vadd.f32 %v998_v60, %v794_v59 }
0x1924   :  { %v1716_v62 = vpop.f32.mrf.mxu0 }
0x1925   :  { %1829 = vtanh.f32 %v1004_v61  ;;  %v805_v61 = vadd.f32 %v2158_v56, %v2213_v58 }
0x1926   :  { %v1001_v63 = vpop.f32.mrf.mxu0 }
0x1928   :  { %v1717_v0 = vpop.f32.mrf.mxu0 }
0x1932   :  { %v1830_v28 = vpop.eup %1829 }
0x1933   :  { %1010 = vrot.lane.b32.xlu1 %v1830_v28, %s1878_s3  ;;  %v1006_v24 = vmul.f32 0.5, %v1830_v28 }
0x1935   :  { %v1007_v2 = vadd.f32 0.5, %v1006_v24 }
0x1937   :  { %v1008_v6 = vmul.f32 %v1007_v2, %v950_v46 }
0x19a5   :  { %v1011_v4 = vpop.permute.xlu1 %1010 }
0x19a6   :  { %v1013_v5 = vmul.f32 %v1011_v4, %v1007_v2 }
0x19a8   :  { %1015 = vrot.lane.b32.xlu0 %v1013_v5, %s1879_s30 }
0x1a1a   :  { %v1016_v7 = vpop.permute.xlu0 %1015 }
0x1a1b   :  { %v1018_v8 = vadd.f32 %v1016_v7, %v1008_v6 }
0x1a1d   :  { %1831 = vtanh.f32 %v1018_v8 }
0x1a2a   :  { %v1832_v55 = vpop.eup %1831 }
0x1a2b   :  { %1021 = vrot.lane.b32.xlu1 %v1832_v55, %s1878_s3 }
0x1a9d   :  { %v1022_v9 = vpop.permute.xlu1 %1021 }
0x1a9e   :  { %v2220_v10 = vmul.f32 %v1022_v9, %v1007_v2 }
0x1aa0   :  { %v1025_v14 = vpack.c.bf16 %v2220_v10, %v2220_v10 }
0x1aa2   :  { %1027 = vrot.lane.b32.xlu0 %v1025_v14, %s1879_s30 }
0x1b14   :  { %v1028_v11 = vpop.permute.xlu0 %1027 }
0x1b15   :  { %1723 = vmatmul.mubr.msk.bf16.vlgmr.msra.gmra.mxu1 %vm155_vm2, %v1028_v11  ;;  %v810_v11 = vadd.f32 %v2207_v27, %v2158_v56 }
0x1b16   :  { %1735 = vmatpush3.bf16.msra.mxu1 %v2126_v3  ;;  %1738 = vmatprep.mubr.msk.bf16.mxu1 %vm1876_vm1, %v1875_v13 }
0x1b17   :  { %1736 = vmatprep.subr.bf16.mxu1 %v1875_v13 }
0x1b1a   :  { %1737 = vmatpush3.bf16.msra.mxu1 %v2133_v52 }
0x1b1b   :  { %1750 = vmatprep.subr.bf16.mxu1 %v1875_v13 }
0x1bd5   :  { %v1066_v18 = vpop.f32.mrf.mxu1 }
0x1bd6   :  { %v1072_v15 = vadd.f32 %v1066_v18, %v797_v17 }
0x1bd7   :  { %v1724_v19 = vpop.f32.mrf.mxu1 }
0x1bd8   :  { %1833 = vtanh.f32 %v1072_v15 }
0x1bd9   :  { %v1069_v22 = vpop.f32.mrf.mxu1 }
0x1bdb   :  { %v1725_v31 = vpop.f32.mrf.mxu1 }
0x1be5   :  { %v1834_v25 = vpop.eup %1833 }
0x1be6   :  { %1078 = vrot.lane.b32.xlu1 %v1834_v25, %s1878_s3  ;;  %v1074_v26 = vmul.f32 0.5, %v1834_v25 }
0x1be8   :  { %v1075_v20 = vadd.f32 0.5, %v1074_v26 }
0x1bea   :  { %v1076_v33 = vmul.f32 %v1075_v20, %v1018_v8 }
0x1c58   :  { %v1079_v30 = vpop.permute.xlu1 %1078 }
0x1c59   :  { %v1081_v32 = vmul.f32 %v1079_v30, %v1075_v20 }
0x1c5b   :  { %1083 = vrot.lane.b32.xlu0 %v1081_v32, %s1879_s30 }
0x1ccd   :  { %v1084_v35 = vpop.permute.xlu0 %1083 }
0x1cce   :  { %v1086_v36 = vadd.f32 %v1084_v35, %v1076_v33 }
0x1cd0   :  { %1835 = vtanh.f32 %v1086_v36 }
0x1cdd   :  { %v1836_v34 = vpop.eup %1835 }
0x1cde   :  { %1089 = vrot.lane.b32.xlu1 %v1836_v34, %s1878_s3 }
0x1d50   :  { %v1090_v37 = vpop.permute.xlu1 %1089 }
0x1d51   :  { %v2237_v38 = vmul.f32 %v1090_v37, %v1075_v20 }
0x1d53   :  { %v1093_v39 = vpack.c.bf16 %v2237_v38, %v2237_v38 }
0x1d55   :  { %1095 = vrot.lane.b32.xlu0 %v1093_v39, %s1879_s30 }
0x1dc7   :  { %v1096_v40 = vpop.permute.xlu0 %1095 }
0x1dc8   :  { %1731 = vmatmul.mubr.msk.bf16.vlgmr.msra.gmra.mxu0 %vm155_vm2, %v1096_v40  ;;  %v813_v40 = vadd.f32 %v2211_v57, %v2158_v56  ;;  %v1787_v57 = vld [vmem:[%s2315_s7 + $0x8] sm:$0xff]  }
0x1dc9   :  { %1743 = vmatpush3.bf16.msra.mxu0 %v2126_v3  ;;  %1746 = vmatprep.mubr.msk.bf16.mxu0 %vm1876_vm1, %v1875_v13 }
0x1dca   :  { %1744 = vmatprep.subr.bf16.mxu0 %v1875_v13 }
0x1dcd   :  { %1745 = vmatpush3.bf16.msra.mxu0 %v2133_v52 }
0x1dce   :  { %1758 = vmatprep.subr.bf16.mxu0 %v1787_v57 }
0x1e88   :  { %v1134_v42 = vpop.f32.mrf.mxu0 }
0x1e89   :  { %v1140_v1 = vadd.f32 %v1134_v42, %v802_v41 }
0x1e8a   :  { %v1732_v23 = vpop.f32.mrf.mxu0 }
0x1e8b   :  { %1837 = vtanh.f32 %v1140_v1 }
0x1e8c   :  { %v1137_v21 = vpop.f32.mrf.mxu0 }
0x1e8e   :  { %v1733_v43 = vpop.f32.mrf.mxu0 }
0x1e98   :  { %v1838_v44 = vpop.eup %1837 }
0x1e99   :  { %1146 = vrot.lane.b32.xlu1 %v1838_v44, %s1878_s3  ;;  %v1142_v45 = vmul.f32 0.5, %v1838_v44 }
0x1e9b   :  { %v1143_v46 = vadd.f32 0.5, %v1142_v45 }
0x1e9d   :  { %v1144_v47 = vmul.f32 %v1143_v46, %v1086_v36 }
0x1f0b   :  { %v1147_v49 = vpop.permute.xlu1 %1146 }
0x1f0c   :  { %v1149_v50 = vmul.f32 %v1147_v49, %v1143_v46 }
0x1f0e   :  { %1151 = vrot.lane.b32.xlu0 %v1149_v50, %s1879_s30  ;;  %v1365_v50 = vpack.c.bf16 %v2192_v29, %v2165_v12 }
0x1f80   :  { %v1152_v51 = vpop.permute.xlu0 %1151 }
0x1f81   :  { %v1154_v48 = vadd.f32 %v1152_v51, %v1144_v47 }
0x1f83   :  { %1839 = vtanh.f32 %v1154_v48 }
0x1f90   :  { %v1840_v53 = vpop.eup %1839 }
0x1f91   :  { %1157 = vrot.lane.b32.xlu1 %v1840_v53, %s1878_s3  ;;  %v1788_v53 = vld [vmem:[%s2315_s7] sm:$0xff]  }
0x2003   :  { %v1158_v54 = vpop.permute.xlu1 %1157 }
0x2004   :  { %v2253_v16 = vmul.f32 %v1158_v54, %v1143_v46  ;;  %v1366_v54 = vpack.c.bf16 %v2237_v38, %v2220_v10  ;;  %v1536_v10 = vld [vmem:[%s2316_s8] ss:$0 sm:$0xff]  ;;  %s1853_s8 = scalar_lea.vmem %s1495_s22, 1024 }
0x2005   :  { %p1854_p0 = scmp.ne.s32.totalorder %s1495_s22, %s1853_s8  ;;  %p1859_p2 = scmp.lt.s32.totalorder %s1853_s8, %s1853_s8 }
0x2006   :  { %v1161_v59 = vpack.c.bf16 %v2253_v16, %v2253_v16 }
0x2007   :  { %p1860_p3 = por %p1859_p2, %p1858_p1 }
0x2008   :  { %1163 = vrot.lane.b32.xlu0 %v1161_v59, %s1879_s30 }
0x2009   :  { %p1861_p4 = pnand %p1860_p3, %p1854_p0 }
0x207a   :  { %v1164_v60 = vpop.permute.xlu0 %1163 }
0x207b   :  { %1739 = vmatmul.mubr.msk.bf16.vlgmr.msra.gmra.mxu1 %vm155_vm2, %v1164_v60 }
0x207c   :  { %1751 = vmatpush3.bf16.msra.mxu1 %v2126_v3  ;;  %1754 = vmatprep.mubr.msk.bf16.mxu1 %vm1876_vm1, %v1875_v13 }
0x207d   :  { %1752 = vmatprep.subr.bf16.mxu1 %v1875_v13 }
0x2080   :  { %1753 = vmatpush3.bf16.msra.mxu1 %v2133_v52 }
0x213b   :  { %v1202_v62 = vpop.f32.mrf.mxu1 }
0x213c   :  { %v1208_v63 = vadd.f32 %v1202_v62, %v805_v61 }
0x213d   :  { %v1740_v0 = vpop.f32.mrf.mxu1 }
0x213e   :  { %1841 = vtanh.f32 %v1208_v63 }
0x213f   :  { %v1205_v28 = vpop.f32.mrf.mxu1 }
0x2141   :  { %v1741_v24 = vpop.f32.mrf.mxu1 }
0x214b   :  { %v1842_v2 = vpop.eup %1841 }
0x214c   :  { %1214 = vrot.lane.b32.xlu1 %v1842_v2, %s1878_s3  ;;  %v1210_v3 = vmul.f32 0.5, %v1842_v2 }
0x214e   :  { %v1211_v4 = vadd.f32 0.5, %v1210_v3 }
0x2150   :  { %v1212_v13 = vmul.f32 %v1211_v4, %v1154_v48 }
0x21be   :  { %v1215_v5 = vpop.permute.xlu1 %1214 }
0x21bf   :  { %v1217_v6 = vmul.f32 %v1215_v5, %v1211_v4 }
0x21c1   :  { %1219 = vrot.lane.b32.xlu0 %v1217_v6, %s1879_s30 }
0x2233   :  { %v1220_v52 = vpop.permute.xlu0 %1219 }
0x2234   :  { %v1222_v7 = vadd.f32 %v1220_v52, %v1212_v13 }
0x2236   :  { %1843 = vtanh.f32 %v1222_v7 }
0x2243   :  { %v1844_v58 = vpop.eup %1843 }
0x2244   :  { %1225 = vrot.lane.b32.xlu1 %v1844_v58, %s1878_s3 }
0x22b6   :  { %v1226_v8 = vpop.permute.xlu1 %1225 }
0x22b7   :  { %v1228_v55 = vmul.f32 %v1226_v8, %v1211_v4 }
0x22b9   :  { %v1229_v9 = vpack.c.bf16 %v1228_v55, %v1228_v55  ;;  %v1367_v56 = vpack.c.bf16 %v1228_v55, %v2253_v16 }
0x22bb   :  { %1231 = vrot.lane.b32.xlu0 %v1229_v9, %s1879_s30 }
0x232d   :  { %v1232_v14 = vpop.permute.xlu0 %1231 }
0x232e   :  { %1747 = vmatmul.mubr.msk.bf16.vlgmr.msra.gmra.mxu0 %vm155_vm2, %v1232_v14 }
0x232f   :  { %1759 = vmatpush3.bf16.msra.mxu0 %v1787_v57 }
0x2330   :  { %1760 = vmatprep.subr.bf16.mxu0 %v1788_v53 }
0x2333   :  { %1761 = vmatpush3.bf16.msra.mxu0 %v1788_v53 }
0x23ee   :  { %v1270_v17 = vpop.f32.mrf.mxu0 }
0x23ef   :  { %v1276_v18 = vadd.f32 %v1270_v17, %v810_v11 }
0x23f0   :  { %v1748_v15 = vpop.f32.mrf.mxu0 }
0x23f1   :  { %1845 = vtanh.f32 %v1276_v18 }
0x23f2   :  { %v1273_v19 = vpop.f32.mrf.mxu0 }
0x23f4   :  { %v1749_v22 = vpop.f32.mrf.mxu0 }
0x23fe   :  { %v1846_v31 = vpop.eup %1845 }
0x23ff   :  { %1282 = vrot.lane.b32.xlu1 %v1846_v31, %s1878_s3  ;;  %v1278_v25 = vmul.f32 0.5, %v1846_v31 }
0x2401   :  { %v1279_v26 = vadd.f32 0.5, %v1278_v25 }
0x2403   :  { %v1280_v32 = vmul.f32 %v1279_v26, %v1222_v7 }
0x2471   :  { %v1283_v20 = vpop.permute.xlu1 %1282 }
0x2472   :  { %v1285_v30 = vmul.f32 %v1283_v20, %v1279_v26 }
0x2474   :  { %1287 = vrot.lane.b32.xlu0 %v1285_v30, %s1879_s30 }
0x24e6   :  { %v1288_v33 = vpop.permute.xlu0 %1287 }
0x24e7   :  { %v1290_v35 = vadd.f32 %v1288_v33, %v1280_v32 }
0x24e9   :  { %1847 = vtanh.f32 %v1290_v35 }
0x24f6   :  { %v1848_v27 = vpop.eup %1847 }
0x24f7   :  { %1293 = vrot.lane.b32.xlu1 %v1848_v27, %s1878_s3 }
0x2569   :  { %v1294_v36 = vpop.permute.xlu1 %1293 }
0x256a   :  { %v1296_v34 = vmul.f32 %v1294_v36, %v1279_v26 }
0x256c   :  { %v1297_v37 = vpack.c.bf16 %v1296_v34, %v1296_v34 }
0x256e   :  { %1299 = vrot.lane.b32.xlu0 %v1297_v37, %s1879_s30 }
0x25e0   :  { %v1300_v39 = vpop.permute.xlu0 %1299 }
0x25e1   :  { %1755 = vmatmul.mubr.msk.bf16.vlgmr.msra.gmra.mxu1 %vm155_vm2, %v1300_v39 }
0x26a1   :  { %v1338_v41 = vpop.f32.mrf.mxu1 }
0x26a2   :  { %v1344_v42 = vadd.f32 %v1338_v41, %v813_v40 }
0x26a3   :  { %v1756_v1 = vpop.f32.mrf.mxu1 }
0x26a4   :  { %1849 = vtanh.f32 %v1344_v42 }
0x26a5   :  { %v1341_v23 = vpop.f32.mrf.mxu1 }
0x26a7   :  { %v1757_v21 = vpop.f32.mrf.mxu1 }
0x26b1   :  { %v1850_v43 = vpop.eup %1849 }
0x26b2   :  { %1350 = vrot.lane.b32.xlu1 %v1850_v43, %s1878_s3  ;;  %v1346_v44 = vmul.f32 0.5, %v1850_v43 }
0x26b4   :  { %v1347_v45 = vadd.f32 0.5, %v1346_v44 }
0x26b6   :  { %v1348_v47 = vmul.f32 %v1347_v45, %v1290_v35 }
0x2724   :  { %v1351_v46 = vpop.permute.xlu1 %1350 }
0x2725   :  { %v1353_v49 = vmul.f32 %v1351_v46, %v1347_v45 }
0x2727   :  { %1355 = vrot.lane.b32.xlu0 %v1353_v49, %s1879_s30 }
0x272b   :  { %1384 = vrot.lane.b32.xlu0 %v1365_v50, %s1879_s30 }
0x272f   :  { %1388 = vrot.lane.b32.xlu0 %v1367_v56, %s1879_s30 }
0x2799   :  { %v1356_v51 = vpop.permute.xlu0 %1355 }
0x279a   :  { %v1358_v48 = vadd.f32 %v1356_v51, %v1348_v47 }
0x279c   :  { %1851 = vtanh.f32 %v1358_v48 }
0x279d   :  { %v1385_v12 = vpop.permute.xlu0 %1384 }
0x279e   :  { %1762 = vmatprep.mubr.msk.bf16.mxu0 %vm155_vm2, %v1385_v12 }
0x27a1   :  { %v1389_v62 = vpop.permute.xlu0 %1388 }
0x27a9   :  { %v1852_v29 = vpop.eup %1851 }
0x27aa   :  { %1361 = vrot.lane.b32.xlu1 %v1852_v29, %s1878_s3 }
0x27ae   :  { %1386 = vrot.lane.b32.xlu1 %v1366_v54, %s1879_s30 }
0x281c   :  { %v1362_v16 = vpop.permute.xlu1 %1361 }
0x281d   :  { %v1364_v59 = vmul.f32 %v1362_v16, %v1347_v45 }
0x281f   :  { %v1368_v60 = vpack.c.bf16 %v1364_v59, %v1296_v34 }
0x2820   :  { %v1387_v61 = vpop.permute.xlu1 %1386 }
0x2821   :  { %1390 = vrot.lane.b32.xlu1 %v1368_v60, %s1879_s30  ;;  %1763 = vmatmul.mubr.msk.bf16.vlgmr.msra.gmra.mxu0 %vm155_vm2, %v1387_v61 }
0x2822   :  { %1766 = vmatprep.mubr.msk.bf16.mxu0 %vm155_vm2, %v1389_v62 }
0x2893   :  { %v1391_v63 = vpop.permute.xlu1 %1390 }
0x2894   :  { %1767 = vmatmul.mubr.msk.bf16.gmra.mxu0 %vm155_vm2, %v1391_v63 }
0x28e1   :  { %v1764_v38 = vpop.f32.mrf.mxu0 }
0x28e2   :  { %v1459_v0 = vadd.f32 %v1764_v38, %v1536_v10 }
0x28e3   :  { %v1450_v28 = vpop.f32.mrf.mxu0 }
0x28e4   :  { %1483 = vst [vmem:[#allocation2 + $0x10] sm:$0xff] %v1459_v0  ;;  %v1451_v24 = vadd.f32 %v1536_v10, %v1450_v28 }
0x28e5   :  { %v1765_v2 = vpop.f32.mrf.mxu0 }
0x28e6   :  { %1481 = vst [vmem:[#allocation2] sm:$0xff] %v1451_v24  ;;  %v1462_v3 = vadd.f32 %v1765_v2, %v1536_v10 }
0x28e7   :  { %v1453_v4 = vpop.f32.mrf.mxu0 }
0x28e8   :  { %1484 = vst [vmem:[#allocation2 + $0x18] sm:$0xff] %v1462_v3  ;;  %v1454_v5 = vadd.f32 %v1536_v10, %v1453_v4 }
0x28ea   :  { %1482 = vst [vmem:[#allocation2 + $0x8] sm:$0xff] %v1454_v5 }
0x2954   :  { %v1768_v6 = vpop.f32.mrf.mxu0 }
0x2955   :  { %v1475_v13 = vadd.f32 %v1768_v6, %v1536_v10 }
0x2956   :  { %v1466_v52 = vpop.f32.mrf.mxu0 }
0x2957   :  { %1487 = vst [vmem:[#allocation2 + $0x30] sm:$0xff] %v1475_v13  ;;  %v1467_v7 = vadd.f32 %v1536_v10, %v1466_v52 }
0x2958   :  { %v1769_v58 = vpop.f32.mrf.mxu0 }
0x2959   :  { %1485 = vst [vmem:[#allocation2 + $0x20] sm:$0xff] %v1467_v7  ;;  %v1478_v8 = vadd.f32 %v1769_v58, %v1536_v10 }
0x295a   :  { %v1469_v55 = vpop.f32.mrf.mxu0 }
0x295b   :  { %1488 = vst [vmem:[#allocation2 + $0x38] sm:$0xff] %v1478_v8  ;;  %v1470_v9 = vadd.f32 %v1536_v10, %v1469_v55 }
0x295d   :  { %1486 = vst [vmem:[#allocation2 + $0x28] sm:$0xff] %v1470_v9 }
0x295e   :  { %1864 = shalt.err (!%p1861_p4)
}
0x295f   :  { %s1881_s23 = smov 128   ;;  %s1882_s24 = smov 8  }
0x2960   :  { %1500 = dma.vmem_to_hbm [thread:$0]  %s1495_s22, 1024, %s2317_s9, [#allocation3], %s1881_s23, %s1881_s23, %s1882_s24  }
0x2961   :  { %1873 = dma.done.wait [#allocation3], 1024  }
0x2962   :  { %1874 = vsyncadd [#allocation3], 4294966272 }
0x2963   :  { %1504 = vsyncpa [#allocation3], 1 }

</bundles_post_ra>
